<compile_context>
chip_gen: v6e
topology: v6e:2x2x1
jax: 0.10.0
libtpu: 0.0.40
codegen_flags: <defaults>
</compile_context>

<pallas_src>
import functools

import jax
import jax.numpy as jnp
from jax.experimental import pallas as pl
from jax.experimental.pallas import tpu as pltpu


def _cdiv(a, b):
    return -(-a // b)


def _round_up(n, m):
    return ((n + m - 1) // m) * m


def _mlp_kernel(x_ref, w1_ref, b1_ref, w2_ref, b2_ref, w3_ref, b3_ref, o_ref,
                *, compute_dtype):
    """fc1 -> ReLU -> fc2 -> ReLU -> fc3 (dropout = identity in eval mode)."""
    # Cast the activation tile to the MXU compute dtype here (not in the
    # wrapper) so no separate XLA cast pass over x is ever materialized.
    x = x_ref[...].astype(compute_dtype)

    # fc1 + ReLU  (MXU accumulates in f32; bias add / ReLU stay f32)
    h1 = jnp.dot(x, w1_ref[...], preferred_element_type=jnp.float32) + b1_ref[...]
    h1 = jnp.maximum(h1, 0.0).astype(compute_dtype)

    # fc2 + ReLU
    h2 = jnp.dot(h1, w2_ref[...], preferred_element_type=jnp.float32) + b2_ref[...]
    h2 = jnp.maximum(h2, 0.0).astype(compute_dtype)

    # fc3 (no activation)
    out = jnp.dot(h2, w3_ref[...], preferred_element_type=jnp.float32) + b3_ref[...]
    o_ref[...] = out.astype(o_ref.dtype)


def prepare_params(w1, b1, w2, b2, w3, b3, compute_dtype=jnp.bfloat16):
    """One-time parameter prep: weights -> MXU compute dtype (in,out layout),
    biases -> f32 with shape (1, d) for clean 2-D broadcast in the kernel."""
    cast_w = lambda w: jnp.asarray(w, compute_dtype)
    cast_b = lambda b: jnp.asarray(b, jnp.float32).reshape(1, -1)
    return (cast_w(w1), cast_b(b1), cast_w(w2), cast_b(b2), cast_w(w3), cast_b(b3))


@functools.partial(jax.jit, static_argnames=("block_b", "out_dtype"))
def alignment_model_forward(x, w1, b1, w2, b2, w3, b3, *,
                            block_b=512, out_dtype=None):
    """x: (B, text_dim) f32 -> (B, image_dim) out_dtype (default x.dtype).

    Weights/biases must come from prepare_params(); the weight dtype sets the
    MXU compute dtype (bf16 for production, f32 as a debug/accuracy path).
    """
    B, d_in = x.shape
    d_h = w1.shape[1]
    d_out = w3.shape[1]
    compute_dtype = w1.dtype
    out_dtype = x.dtype if out_dtype is None else jnp.dtype(out_dtype)

    # ---- batch tile selection ---------------------------------------------
    # 1) how many tiles would the requested block size need?
    n_tiles = _cdiv(B, block_b)
    # 2) pipeline depth: force >= 4 grid steps (2 per TensorCore on v7x with
    #    dimension_semantics=("parallel",)) whenever each step can still feed
    #    >= 128 MXU rows; otherwise a 1-2 step grid gives zero DMA overlap.
    if n_tiles < 4 and B >= 4 * 128:
        n_tiles = 4
    # 3) spread B evenly over the tiles, rounding rows to 16 (f32 sublane=8,
    #    bf16 packed row pairs) instead of padding B to a fixed multiple.
    block = _round_up(_cdiv(B, n_tiles), 16)
    b_pad = n_tiles * block
    if b_pad != B:
        x = jnp.pad(x, ((0, b_pad - B), (0, 0)))

    grid = (n_tiles,)

    flops = 2 * b_pad * (d_in * d_h + d_h * d_h + d_h * d_out)
    bytes_accessed = (
        b_pad * d_in * x.dtype.itemsize
        + sum(a.size * a.dtype.itemsize for a in (w1, b1, w2, b2, w3, b3))
        + b_pad * d_out * jnp.dtype(out_dtype).itemsize
    )

    kernel = functools.partial(_mlp_kernel, compute_dtype=compute_dtype)

    out = pl.pallas_call(
        kernel,
        out_shape=jax.ShapeDtypeStruct((b_pad, d_out), out_dtype),
        grid_spec=pltpu.PrefetchScalarGridSpec(
            num_scalar_prefetch=0,
            grid=grid,
            in_specs=[
                # activations: tiled over the (padded) batch, f32 in HBM
                pl.BlockSpec((block, d_in), lambda i: (i, 0)),
                # weights / biases: constant index_map -> VMEM-resident,
                # fetched once across the whole grid.
                pl.BlockSpec((d_in, d_h), lambda i: (0, 0)),
                pl.BlockSpec((1, d_h), lambda i: (0, 0)),
                pl.BlockSpec((d_h, d_h), lambda i: (0, 0)),
                pl.BlockSpec((1, d_h), lambda i: (0, 0)),
                pl.BlockSpec((d_h, d_out), lambda i: (0, 0)),
                pl.BlockSpec((1, d_out), lambda i: (0, 0)),
            ],
            out_specs=pl.BlockSpec((block, d_out), lambda i: (i, 0)),
        ),
        compiler_params=pltpu.CompilerParams(
            # Batch axis is embarrassingly parallel -> sharded across the two
            # TensorCores on v7x (no-op on v5e/v6e).
            dimension_semantics=("parallel",),
        ),
        cost_estimate=pl.CostEstimate(
            flops=flops, transcendentals=0, bytes_accessed=bytes_accessed),
    )(x, w1, b1, w2, b2, w3, b3)

    return out if b_pad == B else out[:B]


def init_params(key, text_dim=384, image_dim=512, hidden_dim=512):
    """Deterministic PyTorch-like (Kaiming-uniform) init; weights stored (in, out)."""
    def linear(k, fan_in, fan_out):
        kw, kb = jax.random.split(k)
        bound = 1.0 / jnp.sqrt(fan_in)
        w = jax.random.uniform(kw, (fan_in, fan_out), jnp.float32, -bound, bound)
        b = jax.random.uniform(kb, (fan_out,), jnp.float32, -bound, bound)
        return w, b

    k1, k2, k3 = jax.random.split(key, 3)
    w1, b1 = linear(k1, text_dim, hidden_dim)
    w2, b2 = linear(k2, hidden_dim, hidden_dim)
    w3, b3 = linear(k3, hidden_dim, image_dim)
    return w1, b1, w2, b2, w3, b3


def _reference(x, w1, b1, w2, b2, w3, b3, out_dtype):
    """Pure-JAX eval-mode forward mirroring the kernel's dtype handling."""
    cdt = w1.dtype
    h = jnp.dot(x.astype(cdt), w1, preferred_element_type=jnp.float32) + b1
    h = jnp.maximum(h, 0.0).astype(cdt)
    h = jnp.dot(h, w2, preferred_element_type=jnp.float32) + b2
    h = jnp.maximum(h, 0.0).astype(cdt)
    out = jnp.dot(h, w3, preferred_element_type=jnp.float32) + b3
    return out.astype(out_dtype)


if __name__ == "__main__":
    TEXT_DIM, IMAGE_DIM, HIDDEN_DIM = 384, 512, 512

    key = jax.random.PRNGKey(0)
    kx1, kx2, kp = jax.random.split(key, 3)
    raw_params = init_params(kp, TEXT_DIM, IMAGE_DIM, HIDDEN_DIM)

    # 1) small, odd batch -> exercises the pad + slice path; f32 MXU
    #    (debug/accuracy path), f32 output, tight tolerance vs reference.
    params_f32 = prepare_params(*raw_params, compute_dtype=jnp.float32)
    x_small = jax.random.normal(kx1, (13, TEXT_DIM), dtype=jnp.float32)
    out_small = jax.block_until_ready(
        alignment_model_forward(x_small, *params_f32))
    ref_small = _reference(x_small, *params_f32, out_dtype=jnp.float32)
    assert out_small.shape == (13, IMAGE_DIM)
    assert out_small.dtype == jnp.float32
    assert jnp.allclose(out_small, ref_small, atol=1e-5, rtol=1e-5)

    # 2) realistic batch -> 4-step grid (>= 2 steps per v7x TensorCore),
    #    bf16 MXU operands with f32 accumulation, bf16 output (halves the
    #    HBM writeback); relaxed tolerance for bf16 rounding.
    params_bf16 = prepare_params(*raw_params, compute_dtype=jnp.bfloat16)
    x_big = jax.random.normal(kx2, (512, TEXT_DIM), dtype=jnp.float32)
    out_big = jax.block_until_ready(
        alignment_model_forward(x_big, *params_bf16, out_dtype=jnp.bfloat16))
    ref_big = _reference(x_big, *params_bf16, out_dtype=jnp.bfloat16)
    assert out_big.shape == (512, IMAGE_DIM)
    assert out_big.dtype == jnp.bfloat16
    assert jnp.allclose(out_big.astype(jnp.float32), ref_big.astype(jnp.float32),
                        atol=5e-2, rtol=5e-2)

    print("KERNEL_OK")
</pallas_src>

<mosaic_0001>
module attributes {stable_mosaic.version = 11 : i64} {
  func.func @_mlp_kernel(%arg0: i32, %arg1: memref<16x384xf32, #tpu.memory_space<vmem>>, %arg2: memref<384x512xf32, #tpu.memory_space<vmem>>, %arg3: memref<1x512xf32, #tpu.memory_space<vmem>>, %arg4: memref<512x512xf32, #tpu.memory_space<vmem>>, %arg5: memref<1x512xf32, #tpu.memory_space<vmem>>, %arg6: memref<512x512xf32, #tpu.memory_space<vmem>>, %arg7: memref<1x512xf32, #tpu.memory_space<vmem>>, %arg8: memref<16x512xf32, #tpu.memory_space<vmem>>) attributes {dimension_semantics = [#tpu.dimension_semantics<parallel>], iteration_bounds = array<i64: 1>, scalar_prefetch = 0 : i64, scratch_operands = 0 : i64, tpu.core_type = #tpu.core_type<tc>, window_params = [{transform_indices = @transform_0, window_bounds = array<i64: 16, 384>}, {pipeline_mode = #tpu.pipeline_mode<synchronous>, transform_indices = @transform_1, window_bounds = array<i64: 384, 512>}, {pipeline_mode = #tpu.pipeline_mode<synchronous>, transform_indices = @transform_2, window_bounds = array<i64: 1, 512>}, {pipeline_mode = #tpu.pipeline_mode<synchronous>, transform_indices = @transform_3, window_bounds = array<i64: 512, 512>}, {pipeline_mode = #tpu.pipeline_mode<synchronous>, transform_indices = @transform_4, window_bounds = array<i64: 1, 512>}, {pipeline_mode = #tpu.pipeline_mode<synchronous>, transform_indices = @transform_5, window_bounds = array<i64: 512, 512>}, {pipeline_mode = #tpu.pipeline_mode<synchronous>, transform_indices = @transform_6, window_bounds = array<i64: 1, 512>}, {transform_indices = @transform_7, window_bounds = array<i64: 16, 512>}]} {
    %c0 = arith.constant 0 : index
    %c0_0 = arith.constant 0 : index
    %0 = vector.load %arg1[%c0, %c0_0] : memref<16x384xf32, #tpu.memory_space<vmem>>, vector<16x384xf32>
    %c0_1 = arith.constant 0 : index
    %c0_2 = arith.constant 0 : index
    %1 = vector.load %arg2[%c0_1, %c0_2] : memref<384x512xf32, #tpu.memory_space<vmem>>, vector<384x512xf32>
    %cst = arith.constant dense<0.000000e+00> : vector<16x512xf32>
    %2 = tpu.matmul %0, %1, %cst {dimension_numbers = #tpu.dot_dimension_numbers<[1], [0], [0], [1], [0, 0, 1, 1], [], []>} : vector<16x384xf32>, vector<384x512xf32>, vector<16x512xf32> -> vector<16x512xf32>
    %c0_3 = arith.constant 0 : index
    %c0_4 = arith.constant 0 : index
    %3 = vector.load %arg3[%c0_3, %c0_4] : memref<1x512xf32, #tpu.memory_space<vmem>>, vector<1x512xf32>
    %4 = vector.broadcast %3 : vector<1x512xf32> to vector<16x512xf32>
    %5 = arith.addf %2, %4 : vector<16x512xf32>
    %cst_5 = arith.constant 0.000000e+00 : f32
    %6 = vector.broadcast %cst_5 : f32 to vector<16x512xf32>
    %7 = arith.maximumf %5, %6 : vector<16x512xf32>
    %c0_6 = arith.constant 0 : index
    %c0_7 = arith.constant 0 : index
    %8 = vector.load %arg4[%c0_6, %c0_7] : memref<512x512xf32, #tpu.memory_space<vmem>>, vector<512x512xf32>
    %cst_8 = arith.constant dense<0.000000e+00> : vector<16x512xf32>
    %9 = tpu.matmul %7, %8, %cst_8 {dimension_numbers = #tpu.dot_dimension_numbers<[1], [0], [0], [1], [0, 0, 1, 1], [], []>} : vector<16x512xf32>, vector<512x512xf32>, vector<16x512xf32> -> vector<16x512xf32>
    %c0_9 = arith.constant 0 : index
    %c0_10 = arith.constant 0 : index
    %10 = vector.load %arg5[%c0_9, %c0_10] : memref<1x512xf32, #tpu.memory_space<vmem>>, vector<1x512xf32>
    %11 = vector.broadcast %10 : vector<1x512xf32> to vector<16x512xf32>
    %12 = arith.addf %9, %11 : vector<16x512xf32>
    %cst_11 = arith.constant 0.000000e+00 : f32
    %13 = vector.broadcast %cst_11 : f32 to vector<16x512xf32>
    %14 = arith.maximumf %12, %13 : vector<16x512xf32>
    %c0_12 = arith.constant 0 : index
    %c0_13 = arith.constant 0 : index
    %15 = vector.load %arg6[%c0_12, %c0_13] : memref<512x512xf32, #tpu.memory_space<vmem>>, vector<512x512xf32>
    %cst_14 = arith.constant dense<0.000000e+00> : vector<16x512xf32>
    %16 = tpu.matmul %14, %15, %cst_14 {dimension_numbers = #tpu.dot_dimension_numbers<[1], [0], [0], [1], [0, 0, 1, 1], [], []>} : vector<16x512xf32>, vector<512x512xf32>, vector<16x512xf32> -> vector<16x512xf32>
    %c0_15 = arith.constant 0 : index
    %c0_16 = arith.constant 0 : index
    %17 = vector.load %arg7[%c0_15, %c0_16] : memref<1x512xf32, #tpu.memory_space<vmem>>, vector<1x512xf32>
    %18 = vector.broadcast %17 : vector<1x512xf32> to vector<16x512xf32>
    %19 = arith.addf %16, %18 : vector<16x512xf32>
    %c0_17 = arith.constant 0 : index
    %c0_18 = arith.constant 0 : index
    %20 = vector.load %arg8[%c0_17, %c0_18] : memref<16x512xf32, #tpu.memory_space<vmem>>, vector<16x512xf32>
    tpu.vector_store %arg8[%c0_17, %c0_18], %19 {strides = array<i32>} : memref<16x512xf32, #tpu.memory_space<vmem>>, vector<16x512xf32>,
    return
  }
  func.func @transform_0(%arg0: i32) -> (i32, i32) {
    %c0_i32 = arith.constant 0 : i32
    %c0_i32_0 = arith.constant 0 : i32
    return %arg0, %c0_i32 : i32, i32
  }
  func.func @transform_1(%arg0: i32) -> (i32, i32) {
    %c0_i32 = arith.constant 0 : i32
    %c0_i32_0 = arith.constant 0 : i32
    %c0_i32_1 = arith.constant 0 : i32
    return %c0_i32, %c0_i32_0 : i32, i32
  }
  func.func @transform_2(%arg0: i32) -> (i32, i32) {
    %c0_i32 = arith.constant 0 : i32
    %c0_i32_0 = arith.constant 0 : i32
    %c0_i32_1 = arith.constant 0 : i32
    return %c0_i32, %c0_i32_0 : i32, i32
  }
  func.func @transform_3(%arg0: i32) -> (i32, i32) {
    %c0_i32 = arith.constant 0 : i32
    %c0_i32_0 = arith.constant 0 : i32
    %c0_i32_1 = arith.constant 0 : i32
    return %c0_i32, %c0_i32_0 : i32, i32
  }
  func.func @transform_4(%arg0: i32) -> (i32, i32) {
    %c0_i32 = arith.constant 0 : i32
    %c0_i32_0 = arith.constant 0 : i32
    %c0_i32_1 = arith.constant 0 : i32
    return %c0_i32, %c0_i32_0 : i32, i32
  }
  func.func @transform_5(%arg0: i32) -> (i32, i32) {
    %c0_i32 = arith.constant 0 : i32
    %c0_i32_0 = arith.constant 0 : i32
    %c0_i32_1 = arith.constant 0 : i32
    return %c0_i32, %c0_i32_0 : i32, i32
  }
  func.func @transform_6(%arg0: i32) -> (i32, i32) {
    %c0_i32 = arith.constant 0 : i32
    %c0_i32_0 = arith.constant 0 : i32
    %c0_i32_1 = arith.constant 0 : i32
    return %c0_i32, %c0_i32_0 : i32, i32
  }
  func.func @transform_7(%arg0: i32) -> (i32, i32) {
    %c0_i32 = arith.constant 0 : i32
    %c0_i32_0 = arith.constant 0 : i32
    return %arg0, %c0_i32 : i32, i32
  }
}

</mosaic_0001>

<bundles_post_ra>
// kernel: alignment_model_forward.1
= control target key start
LH: loop header
LB: loop body
LE: loop exit
PB: predicated region body
PF: predicated region fallthrough
CT: control target
= control target key end

     0   :  { %12 = vsyncpa [#allocation3], 0  ;;  %s2151_s0 = inlined_call_operand.vmem [shape: f32[16,384], index: 0, kind: input, shape index: {}]   ;;  %s2152_s1 = inlined_call_operand.hbm [shape: f32[384,512], index: 1, kind: input, shape index: {}]   ;;  %s2153_s2 = inlined_call_operand.vmem [shape: f32[1,512], index: 2, kind: input, shape index: {}]   ;;  %s2154_s3 = inlined_call_operand.hbm [shape: f32[512,512], index: 3, kind: input, shape index: {}]   ;;  %s2155_s4 = inlined_call_operand.vmem [shape: f32[1,512], index: 4, kind: input, shape index: {}]   ;;  %s2156_s5 = inlined_call_operand.hbm [shape: f32[512,512], index: 5, kind: input, shape index: {}]   ;;  %s2157_s6 = inlined_call_operand.vmem [shape: f32[1,512], index: 6, kind: input, shape index: {}]   ;;  %s2158_s7 = inlined_call_operand.hbm [shape: f32[16,512], index: 7, kind: output, shape index: {}]  }
   0x1   :  { %13 = vsyncpa [#allocation6], 0 }
   0x2   :  { %14 = vsyncpa [#allocation4], 0  ;;  %s1903_s24 = smov [#allocation5]   ;;  %s1904_s26 = smov [#allocation2]  }
   0x3   :  { %s36_s25 = sshll.u32 %s1903_s24, 4  ;;  %s22_s27 = sshll.u32 %s1904_s26, 4  ;;  %s37_s25 = int_to_ptr.vmem [resolvable:$true] %s36_s25  ;;  %s23_s27 = int_to_ptr.vmem [resolvable:$true] %s22_s27 }
   0x4   :  { %s1825_s28 = scalar_lea.vmem %s37_s25, 32768  ;;  %p1830_p1 = scmp.lt.s32.totalorder %s37_s25, %s37_s25 }
   0x5   :  { %p1826_p0 = scmp.ne.s32.totalorder %s37_s25, %s1825_s28  ;;  %p1831_p2 = scmp.lt.s32.totalorder %s1825_s28, %s1825_s28 }
   0x7   :  { %p1832_p3 = por %p1831_p2, %p1830_p1 }
   0x9   :  { %p1833_p4 = pnand %p1832_p3, %p1826_p0 }
   0xb   :  { %1836 = shalt.err (!%p1833_p4)
}
   0xc   :  { %s1905_s29 = smov 512   ;;  %s1906_s30 = smov 32  }
   0xd   :  { %42 = dma.hbm_to_vmem [thread:$0]  %s2154_s3, 32768, %s37_s25, [#allocation6], %s1905_s29, %s1905_s29, %s1906_s30  }
   0xe   :  { %s1845_s10 = scalar_lea.vmem %s23_s27, 24576  ;;  %p1850_p6 = scmp.lt.s32.totalorder %s23_s27, %s23_s27 }
   0xf   :  { %p1846_p5 = scmp.ne.s32.totalorder %s23_s27, %s1845_s10  ;;  %p1851_p7 = scmp.lt.s32.totalorder %s1845_s10, %s1845_s10 }
  0x11   :  { %p1852_p8 = por %p1851_p7, %p1850_p6 }
  0x13   :  { %p1853_p9 = pnand %p1852_p8, %p1846_p5 }
  0x15   :  { %1856 = shalt.err (!%p1853_p9)
}
  0x16   :  { %28 = dma.hbm_to_vmem [thread:$0]  %s2152_s1, 24576, %s23_s27, [#allocation3], %s1905_s29, %s1905_s29, %s1906_s30  }
  0x17   :  { %s1907_s13 = smov [#allocation7]  }
  0x18   :  { %s50_s14 = sshll.u32 %s1907_s13, 4  ;;  %s51_s14 = int_to_ptr.vmem [resolvable:$true] %s50_s14 }
  0x19   :  { %s1865_s15 = scalar_lea.vmem %s51_s14, 32768  ;;  %p1870_p11 = scmp.lt.s32.totalorder %s51_s14, %s51_s14 }
  0x1a   :  { %p1866_p10 = scmp.ne.s32.totalorder %s51_s14, %s1865_s15  ;;  %p1871_p12 = scmp.lt.s32.totalorder %s1865_s15, %s1865_s15 }
  0x1c   :  { %p1872_p13 = por %p1871_p12, %p1870_p11 }
  0x1e   :  { %p1873_p0 = pnand %p1872_p13, %p1866_p10 }
  0x20   :  { %1876 = shalt.err (!%p1873_p0)
}
  0x21   :  { %56 = dma.hbm_to_vmem [thread:$0]  %s2156_s5, 32768, %s51_s14, [#allocation6], %s1905_s29, %s1905_s29, %s1906_s30  }
  0x22   :  { %1897 = dma.done.wait [#allocation3], 24576  }
  0x23   :  { %1898 = vsyncadd [#allocation3], 4294942720 }
  0x24   :  { %1899 = dma.done.wait [#allocation6], 65536  }
  0x25   :  { %1900 = vsyncadd [#allocation6], 4294901760  ;;  %v1908_v0 = vmov 0.0   ;;  %v135_v1 = vld [vmem:[#allocation2 + $0x1e8] sm:$0xff]  ;;  %v134_v3 = vld [vmem:[#allocation2 + $0x1e0] sm:$0xff] }
  0x26   :  { %429 = vmatprep.mubr.f32.mxu1 %v1908_v0  ;;  %v263_v2 = vld [vmem:[#allocation2 + $0x5e8] sm:$0xff]  ;;  %288 = vmatprep.subr.mxu0 %v135_v1  ;;  %v262_v4 = vld [vmem:[#allocation2 + $0x5e0] sm:$0xff] }
  0x27   :  { %365 = vmatprep.subr.mxu1 %v263_v2  ;;  %v131_v5 = vld [vmem:[#allocation2 + $0x1c8] sm:$0xff]  ;;  %289 = vmatpush1.msra.mxu0 %v134_v3  ;;  %v130_v7 = vld [vmem:[#allocation2 + $0x1c0] sm:$0xff]  ;;  %v1972_v3 = vld [vmem:[%s2151_s0 + $0x10] sm:$0xff] }
  0x28   :  { %v259_v6 = vld [vmem:[#allocation2 + $0x5c8] sm:$0xff]  ;;  %366 = vmatpush1.msra.mxu1 %v262_v4  ;;  %v258_v8 = vld [vmem:[#allocation2 + $0x5c0] sm:$0xff]  ;;  %290 = vmatprep.subr.mxu0 %v131_v5  ;;  %v137_v4 = vld [vmem:[#allocation2 + $0x1f8] sm:$0xff] }
  0x29   :  { %v127_v9 = vld [vmem:[#allocation2 + $0x1a8] sm:$0xff]  ;;  %367 = vmatprep.subr.mxu1 %v259_v6  ;;  %v126_v11 = vld [vmem:[#allocation2 + $0x1a0] sm:$0xff]  ;;  %291 = vmatpush1.msra.mxu0 %v130_v7  ;;  %v136_v6 = vld [vmem:[#allocation2 + $0x1f0] sm:$0xff] }
  0x2a   :  { %v255_v10 = vld [vmem:[#allocation2 + $0x5a8] sm:$0xff]  ;;  %v254_v12 = vld [vmem:[#allocation2 + $0x5a0] sm:$0xff]  ;;  %368 = vmatpush1.msra.mxu1 %v258_v8  ;;  %292 = vmatprep.subr.mxu0 %v127_v9  ;;  %v133_v8 = vld [vmem:[#allocation2 + $0x1d8] sm:$0xff] }
  0x2b   :  { %v123_v13 = vld [vmem:[#allocation2 + $0x188] sm:$0xff]  ;;  %369 = vmatprep.subr.mxu1 %v255_v10  ;;  %v122_v15 = vld [vmem:[#allocation2 + $0x180] sm:$0xff]  ;;  %293 = vmatpush1.msra.mxu0 %v126_v11  ;;  %v132_v10 = vld [vmem:[#allocation2 + $0x1d0] sm:$0xff] }
  0x2c   :  { %v251_v14 = vld [vmem:[#allocation2 + $0x588] sm:$0xff]  ;;  %v250_v16 = vld [vmem:[#allocation2 + $0x580] sm:$0xff]  ;;  %370 = vmatpush1.msra.mxu1 %v254_v12  ;;  %294 = vmatprep.subr.mxu0 %v123_v13  ;;  %v129_v12 = vld [vmem:[#allocation2 + $0x1b8] sm:$0xff] }
  0x2d   :  { %v119_v17 = vld [vmem:[#allocation2 + $0x168] sm:$0xff]  ;;  %371 = vmatprep.subr.mxu1 %v251_v14  ;;  %v118_v19 = vld [vmem:[#allocation2 + $0x160] sm:$0xff]  ;;  %295 = vmatpush1.msra.mxu0 %v122_v15  ;;  %v128_v14 = vld [vmem:[#allocation2 + $0x1b0] sm:$0xff] }
  0x2e   :  { %v247_v18 = vld [vmem:[#allocation2 + $0x568] sm:$0xff]  ;;  %v246_v20 = vld [vmem:[#allocation2 + $0x560] sm:$0xff]  ;;  %372 = vmatpush1.msra.mxu1 %v250_v16  ;;  %296 = vmatprep.subr.mxu0 %v119_v17  ;;  %v125_v16 = vld [vmem:[#allocation2 + $0x198] sm:$0xff] }
  0x2f   :  { %v115_v21 = vld [vmem:[#allocation2 + $0x148] sm:$0xff]  ;;  %373 = vmatprep.subr.mxu1 %v247_v18  ;;  %v114_v23 = vld [vmem:[#allocation2 + $0x140] sm:$0xff]  ;;  %297 = vmatpush1.msra.mxu0 %v118_v19  ;;  %v124_v18 = vld [vmem:[#allocation2 + $0x190] sm:$0xff] }
  0x30   :  { %v243_v22 = vld [vmem:[#allocation2 + $0x548] sm:$0xff]  ;;  %v242_v24 = vld [vmem:[#allocation2 + $0x540] sm:$0xff]  ;;  %374 = vmatpush1.msra.mxu1 %v246_v20  ;;  %298 = vmatprep.subr.mxu0 %v115_v21  ;;  %v121_v20 = vld [vmem:[#allocation2 + $0x178] sm:$0xff] }
  0x31   :  { %v111_v25 = vld [vmem:[#allocation2 + $0x128] sm:$0xff]  ;;  %375 = vmatprep.subr.mxu1 %v243_v22  ;;  %v110_v27 = vld [vmem:[#allocation2 + $0x120] sm:$0xff]  ;;  %299 = vmatpush1.msra.mxu0 %v114_v23  ;;  %v120_v22 = vld [vmem:[#allocation2 + $0x170] sm:$0xff] }
  0x32   :  { %v239_v26 = vld [vmem:[#allocation2 + $0x528] sm:$0xff]  ;;  %v238_v28 = vld [vmem:[#allocation2 + $0x520] sm:$0xff]  ;;  %376 = vmatpush1.msra.mxu1 %v242_v24  ;;  %300 = vmatprep.subr.mxu0 %v111_v25  ;;  %v117_v24 = vld [vmem:[#allocation2 + $0x158] sm:$0xff] }
  0x33   :  { %v107_v29 = vld [vmem:[#allocation2 + $0x108] sm:$0xff]  ;;  %377 = vmatprep.subr.mxu1 %v239_v26  ;;  %v106_v31 = vld [vmem:[#allocation2 + $0x100] sm:$0xff]  ;;  %301 = vmatpush1.msra.mxu0 %v110_v27  ;;  %v116_v26 = vld [vmem:[#allocation2 + $0x150] sm:$0xff] }
  0x34   :  { %v235_v30 = vld [vmem:[#allocation2 + $0x508] sm:$0xff]  ;;  %v234_v32 = vld [vmem:[#allocation2 + $0x500] sm:$0xff]  ;;  %378 = vmatpush1.msra.mxu1 %v238_v28  ;;  %302 = vmatprep.subr.mxu0 %v107_v29  ;;  %v113_v28 = vld [vmem:[#allocation2 + $0x138] sm:$0xff] }
  0x35   :  { %v103_v33 = vld [vmem:[#allocation2 + $0xe8] sm:$0xff]  ;;  %379 = vmatprep.subr.mxu1 %v235_v30  ;;  %v102_v35 = vld [vmem:[#allocation2 + $0xe0] sm:$0xff]  ;;  %303 = vmatpush1.msra.mxu0 %v106_v31  ;;  %v112_v30 = vld [vmem:[#allocation2 + $0x130] sm:$0xff] }
  0x36   :  { %v231_v34 = vld [vmem:[#allocation2 + $0x4e8] sm:$0xff]  ;;  %v230_v36 = vld [vmem:[#allocation2 + $0x4e0] sm:$0xff]  ;;  %380 = vmatpush1.msra.mxu1 %v234_v32  ;;  %304 = vmatprep.subr.mxu0 %v103_v33  ;;  %v109_v32 = vld [vmem:[#allocation2 + $0x118] sm:$0xff] }
  0x37   :  { %v99_v37 = vld [vmem:[#allocation2 + $0xc8] sm:$0xff]  ;;  %381 = vmatprep.subr.mxu1 %v231_v34  ;;  %v98_v39 = vld [vmem:[#allocation2 + $0xc0] sm:$0xff]  ;;  %305 = vmatpush1.msra.mxu0 %v102_v35  ;;  %v108_v34 = vld [vmem:[#allocation2 + $0x110] sm:$0xff] }
  0x38   :  { %v227_v38 = vld [vmem:[#allocation2 + $0x4c8] sm:$0xff]  ;;  %v226_v40 = vld [vmem:[#allocation2 + $0x4c0] sm:$0xff]  ;;  %382 = vmatpush1.msra.mxu1 %v230_v36  ;;  %306 = vmatprep.subr.mxu0 %v99_v37  ;;  %v105_v36 = vld [vmem:[#allocation2 + $0xf8] sm:$0xff] }
  0x39   :  { %v95_v41 = vld [vmem:[#allocation2 + $0xa8] sm:$0xff]  ;;  %383 = vmatprep.subr.mxu1 %v227_v38  ;;  %v94_v43 = vld [vmem:[#allocation2 + $0xa0] sm:$0xff]  ;;  %307 = vmatpush1.msra.mxu0 %v98_v39  ;;  %v104_v38 = vld [vmem:[#allocation2 + $0xf0] sm:$0xff] }
  0x3a   :  { %v223_v42 = vld [vmem:[#allocation2 + $0x4a8] sm:$0xff]  ;;  %v222_v44 = vld [vmem:[#allocation2 + $0x4a0] sm:$0xff]  ;;  %384 = vmatpush1.msra.mxu1 %v226_v40  ;;  %308 = vmatprep.subr.mxu0 %v95_v41  ;;  %v101_v40 = vld [vmem:[#allocation2 + $0xd8] sm:$0xff] }
  0x3b   :  { %v91_v45 = vld [vmem:[#allocation2 + $0x88] sm:$0xff]  ;;  %385 = vmatprep.subr.mxu1 %v223_v42  ;;  %v90_v47 = vld [vmem:[#allocation2 + $0x80] sm:$0xff]  ;;  %309 = vmatpush1.msra.mxu0 %v94_v43  ;;  %v100_v42 = vld [vmem:[#allocation2 + $0xd0] sm:$0xff] }
  0x3c   :  { %v219_v46 = vld [vmem:[#allocation2 + $0x488] sm:$0xff]  ;;  %v218_v48 = vld [vmem:[#allocation2 + $0x480] sm:$0xff]  ;;  %386 = vmatpush1.msra.mxu1 %v222_v44  ;;  %310 = vmatprep.subr.mxu0 %v91_v45  ;;  %v97_v44 = vld [vmem:[#allocation2 + $0xb8] sm:$0xff] }
  0x3d   :  { %v87_v49 = vld [vmem:[#allocation2 + $0x68] sm:$0xff]  ;;  %387 = vmatprep.subr.mxu1 %v219_v46  ;;  %v86_v51 = vld [vmem:[#allocation2 + $0x60] sm:$0xff]  ;;  %311 = vmatpush1.msra.mxu0 %v90_v47  ;;  %v96_v46 = vld [vmem:[#allocation2 + $0xb0] sm:$0xff] }
  0x3e   :  { %v215_v50 = vld [vmem:[#allocation2 + $0x468] sm:$0xff]  ;;  %v214_v52 = vld [vmem:[#allocation2 + $0x460] sm:$0xff]  ;;  %388 = vmatpush1.msra.mxu1 %v218_v48  ;;  %312 = vmatprep.subr.mxu0 %v87_v49  ;;  %v93_v48 = vld [vmem:[#allocation2 + $0x98] sm:$0xff] }
  0x3f   :  { %v83_v53 = vld [vmem:[#allocation2 + $0x48] sm:$0xff]  ;;  %389 = vmatprep.subr.mxu1 %v215_v50  ;;  %v82_v55 = vld [vmem:[#allocation2 + $0x40] sm:$0xff]  ;;  %313 = vmatpush1.msra.mxu0 %v86_v51  ;;  %v92_v50 = vld [vmem:[#allocation2 + $0x90] sm:$0xff] }
  0x40   :  { %v211_v54 = vld [vmem:[#allocation2 + $0x448] sm:$0xff]  ;;  %v210_v56 = vld [vmem:[#allocation2 + $0x440] sm:$0xff]  ;;  %390 = vmatpush1.msra.mxu1 %v214_v52  ;;  %314 = vmatprep.subr.mxu0 %v83_v53  ;;  %v89_v52 = vld [vmem:[#allocation2 + $0x78] sm:$0xff] }
  0x41   :  { %v79_v57 = vld [vmem:[#allocation2 + $0x28] sm:$0xff]  ;;  %391 = vmatprep.subr.mxu1 %v211_v54  ;;  %v78_v59 = vld [vmem:[#allocation2 + $0x20] sm:$0xff]  ;;  %315 = vmatpush1.msra.mxu0 %v82_v55  ;;  %v88_v54 = vld [vmem:[#allocation2 + $0x70] sm:$0xff] }
  0x42   :  { %v207_v58 = vld [vmem:[#allocation2 + $0x428] sm:$0xff]  ;;  %v206_v60 = vld [vmem:[#allocation2 + $0x420] sm:$0xff]  ;;  %392 = vmatpush1.msra.mxu1 %v210_v56  ;;  %316 = vmatprep.subr.mxu0 %v79_v57  ;;  %v85_v56 = vld [vmem:[#allocation2 + $0x58] sm:$0xff] }
  0x43   :  { %v75_v61 = vld [vmem:[#allocation2 + $0x8] sm:$0xff]  ;;  %393 = vmatprep.subr.mxu1 %v207_v58  ;;  %v74_v63 = vld [vmem:[#allocation2] sm:$0xff]  ;;  %317 = vmatpush1.msra.mxu0 %v78_v59  ;;  %v84_v58 = vld [vmem:[#allocation2 + $0x50] sm:$0xff] }
  0x44   :  { %v203_v62 = vld [vmem:[#allocation2 + $0x408] sm:$0xff]  ;;  %v202_v1 = vld [vmem:[#allocation2 + $0x400] sm:$0xff]  ;;  %394 = vmatpush1.msra.mxu1 %v206_v60  ;;  %318 = vmatprep.subr.mxu0 %v75_v61  ;;  %v81_v60 = vld [vmem:[#allocation2 + $0x38] sm:$0xff] }
  0x45   :  { %v199_v2 = vld [vmem:[#allocation2 + $0x3e8] sm:$0xff]  ;;  %395 = vmatprep.subr.mxu1 %v203_v62  ;;  %v198_v5 = vld [vmem:[#allocation2 + $0x3e0] sm:$0xff]  ;;  %319 = vmatpush1.msra.mxu0 %v74_v63  ;;  %v80_v62 = vld [vmem:[#allocation2 + $0x30] sm:$0xff] }
  0x46   :  { %396 = vmatpush1.msra.mxu1 %v202_v1  ;;  %v195_v7 = vld [vmem:[#allocation2 + $0x3c8] sm:$0xff]  ;;  %320 = vmatprep.subr.mxu0 %v199_v2  ;;  %v194_v9 = vld [vmem:[#allocation2 + $0x3c0] sm:$0xff]  ;;  %v77_v1 = vld [vmem:[#allocation2 + $0x18] sm:$0xff] }
  0x47   :  { %430 = vmatmul.mubr.f32.vlgmr.msra.gmra.mxu1 %v1972_v3  ;;  %442 = vmatprep.subr.mxu1 %v137_v4  ;;  %v191_v11 = vld [vmem:[#allocation2 + $0x3a8] sm:$0xff]  ;;  %v190_v13 = vld [vmem:[#allocation2 + $0x3a0] sm:$0xff] }
  0x48   :  { %321 = vmatpush2.msra.mxu0 %v198_v5  ;;  %443 = vmatpush1.msra.mxu1 %v136_v6  ;;  %v187_v15 = vld [vmem:[#allocation2 + $0x388] sm:$0xff]  ;;  %v186_v17 = vld [vmem:[#allocation2 + $0x380] sm:$0xff]  ;;  %v76_v5 = vld [vmem:[#allocation2 + $0x10] sm:$0xff] }
  0x49   :  { %322 = vmatprep.subr.mxu0 %v195_v7  ;;  %444 = vmatprep.subr.mxu1 %v133_v8  ;;  %v183_v19 = vld [vmem:[#allocation2 + $0x368] sm:$0xff]  ;;  %v182_v21 = vld [vmem:[#allocation2 + $0x360] sm:$0xff]  ;;  %v201_v7 = vld [vmem:[#allocation2 + $0x3f8] sm:$0xff] }
  0x4a   :  { %323 = vmatpush2.msra.mxu0 %v194_v9  ;;  %445 = vmatpush1.msra.mxu1 %v132_v10  ;;  %v179_v23 = vld [vmem:[#allocation2 + $0x348] sm:$0xff]  ;;  %v178_v25 = vld [vmem:[#allocation2 + $0x340] sm:$0xff]  ;;  %v265_v8 = vld [vmem:[#allocation2 + $0x5f8] sm:$0xff] }
  0x4b   :  { %324 = vmatprep.subr.mxu0 %v191_v11  ;;  %446 = vmatprep.subr.mxu1 %v129_v12  ;;  %v175_v27 = vld [vmem:[#allocation2 + $0x328] sm:$0xff]  ;;  %v174_v29 = vld [vmem:[#allocation2 + $0x320] sm:$0xff]  ;;  %v200_v9 = vld [vmem:[#allocation2 + $0x3f0] sm:$0xff] }
  0x4c   :  { %325 = vmatpush2.msra.mxu0 %v190_v13  ;;  %447 = vmatpush1.msra.mxu1 %v128_v14  ;;  %v171_v31 = vld [vmem:[#allocation2 + $0x308] sm:$0xff]  ;;  %v170_v33 = vld [vmem:[#allocation2 + $0x300] sm:$0xff]  ;;  %v264_v10 = vld [vmem:[#allocation2 + $0x5f0] sm:$0xff] }
  0x4d   :  { %326 = vmatprep.subr.mxu0 %v187_v15  ;;  %448 = vmatprep.subr.mxu1 %v125_v16  ;;  %v167_v35 = vld [vmem:[#allocation2 + $0x2e8] sm:$0xff]  ;;  %v166_v37 = vld [vmem:[#allocation2 + $0x2e0] sm:$0xff]  ;;  %v197_v11 = vld [vmem:[#allocation2 + $0x3d8] sm:$0xff] }
  0x4e   :  { %327 = vmatpush2.msra.mxu0 %v186_v17  ;;  %449 = vmatpush1.msra.mxu1 %v124_v18  ;;  %v163_v39 = vld [vmem:[#allocation2 + $0x2c8] sm:$0xff]  ;;  %v162_v41 = vld [vmem:[#allocation2 + $0x2c0] sm:$0xff]  ;;  %v261_v12 = vld [vmem:[#allocation2 + $0x5d8] sm:$0xff] }
  0x4f   :  { %328 = vmatprep.subr.mxu0 %v183_v19  ;;  %450 = vmatprep.subr.mxu1 %v121_v20  ;;  %v159_v43 = vld [vmem:[#allocation2 + $0x2a8] sm:$0xff]  ;;  %v158_v45 = vld [vmem:[#allocation2 + $0x2a0] sm:$0xff]  ;;  %v196_v14 = vld [vmem:[#allocation2 + $0x3d0] sm:$0xff] }
  0x50   :  { %329 = vmatpush2.msra.mxu0 %v182_v21  ;;  %451 = vmatpush1.msra.mxu1 %v120_v22  ;;  %v155_v47 = vld [vmem:[#allocation2 + $0x288] sm:$0xff]  ;;  %v154_v49 = vld [vmem:[#allocation2 + $0x280] sm:$0xff]  ;;  %v260_v15 = vld [vmem:[#allocation2 + $0x5d0] sm:$0xff] }
  0x51   :  { %330 = vmatprep.subr.mxu0 %v179_v23  ;;  %452 = vmatprep.subr.mxu1 %v117_v24  ;;  %v151_v51 = vld [vmem:[#allocation2 + $0x268] sm:$0xff]  ;;  %v150_v53 = vld [vmem:[#allocation2 + $0x260] sm:$0xff]  ;;  %v1995_v16 = vld [vmem:[%s2151_s0 + $0x18] sm:$0xff] }
  0x52   :  { %331 = vmatpush2.msra.mxu0 %v178_v25  ;;  %453 = vmatpush1.msra.mxu1 %v116_v26  ;;  %v147_v55 = vld [vmem:[#allocation2 + $0x248] sm:$0xff]  ;;  %v146_v57 = vld [vmem:[#allocation2 + $0x240] sm:$0xff]  ;;  %v193_v17 = vld [vmem:[#allocation2 + $0x3b8] sm:$0xff] }
  0x53   :  { %332 = vmatprep.subr.mxu0 %v175_v27  ;;  %454 = vmatprep.subr.mxu1 %v113_v28  ;;  %v143_v59 = vld [vmem:[#allocation2 + $0x228] sm:$0xff]  ;;  %v142_v61 = vld [vmem:[#allocation2 + $0x220] sm:$0xff]  ;;  %v257_v18 = vld [vmem:[#allocation2 + $0x5b8] sm:$0xff] }
  0x54   :  { %333 = vmatpush2.msra.mxu0 %v174_v29  ;;  %455 = vmatpush1.msra.mxu1 %v112_v30  ;;  %v139_v63 = vld [vmem:[#allocation2 + $0x208] sm:$0xff]  ;;  %v138_v2 = vld [vmem:[#allocation2 + $0x200] sm:$0xff]  ;;  %v192_v19 = vld [vmem:[#allocation2 + $0x3b0] sm:$0xff] }
  0x55   :  { %334 = vmatprep.subr.mxu0 %v171_v31  ;;  %456 = vmatprep.subr.mxu1 %v109_v32  ;;  %v1978_v4 = vld [vmem:[%s2151_s0 + $0x8] sm:$0xff]  ;;  %v1983_v6 = vld [vmem:[%s2151_s0] sm:$0xff]  ;;  %v256_v20 = vld [vmem:[#allocation2 + $0x5b0] sm:$0xff] }
  0x56   :  { %335 = vmatpush2.msra.mxu0 %v170_v33  ;;  %457 = vmatpush1.msra.mxu1 %v108_v34  ;;  %v1990_v13 = vld [vmem:[%s2151_s0 + $0x20] sm:$0xff]  ;;  %v2002_v21 = vld [vmem:[%s2151_s0 + $0x28] sm:$0xff]  ;;  %v189_v22 = vld [vmem:[#allocation2 + $0x398] sm:$0xff] }
  0x57   :  { %336 = vmatprep.subr.mxu0 %v167_v35  ;;  %458 = vmatprep.subr.mxu1 %v105_v36  ;;  %v253_v23 = vld [vmem:[#allocation2 + $0x598] sm:$0xff]  ;;  %v188_v24 = vld [vmem:[#allocation2 + $0x390] sm:$0xff] }
  0x58   :  { %337 = vmatpush2.msra.mxu0 %v166_v37  ;;  %459 = vmatpush1.msra.mxu1 %v104_v38  ;;  %v252_v25 = vld [vmem:[#allocation2 + $0x590] sm:$0xff]  ;;  %v185_v26 = vld [vmem:[#allocation2 + $0x378] sm:$0xff] }
  0x59   :  { %338 = vmatprep.subr.mxu0 %v163_v39  ;;  %460 = vmatprep.subr.mxu1 %v101_v40  ;;  %v249_v27 = vld [vmem:[#allocation2 + $0x578] sm:$0xff]  ;;  %v184_v28 = vld [vmem:[#allocation2 + $0x370] sm:$0xff] }
  0x5a   :  { %339 = vmatpush2.msra.mxu0 %v162_v41  ;;  %461 = vmatpush1.msra.mxu1 %v100_v42  ;;  %v248_v29 = vld [vmem:[#allocation2 + $0x570] sm:$0xff]  ;;  %v181_v30 = vld [vmem:[#allocation2 + $0x358] sm:$0xff] }
  0x5b   :  { %340 = vmatprep.subr.mxu0 %v159_v43  ;;  %462 = vmatprep.subr.mxu1 %v97_v44  ;;  %v245_v31 = vld [vmem:[#allocation2 + $0x558] sm:$0xff]  ;;  %v180_v32 = vld [vmem:[#allocation2 + $0x350] sm:$0xff] }
  0x5c   :  { %341 = vmatpush2.msra.mxu0 %v158_v45  ;;  %463 = vmatpush1.msra.mxu1 %v96_v46  ;;  %v244_v33 = vld [vmem:[#allocation2 + $0x550] sm:$0xff]  ;;  %v177_v34 = vld [vmem:[#allocation2 + $0x338] sm:$0xff] }
  0x5d   :  { %342 = vmatprep.subr.mxu0 %v155_v47  ;;  %464 = vmatprep.subr.mxu1 %v93_v48  ;;  %v241_v35 = vld [vmem:[#allocation2 + $0x538] sm:$0xff]  ;;  %v176_v36 = vld [vmem:[#allocation2 + $0x330] sm:$0xff] }
  0x5e   :  { %343 = vmatpush2.msra.mxu0 %v154_v49  ;;  %465 = vmatpush1.msra.mxu1 %v92_v50  ;;  %v240_v37 = vld [vmem:[#allocation2 + $0x530] sm:$0xff]  ;;  %v173_v38 = vld [vmem:[#allocation2 + $0x318] sm:$0xff] }
  0x5f   :  { %344 = vmatprep.subr.mxu0 %v151_v51  ;;  %466 = vmatprep.subr.mxu1 %v89_v52  ;;  %v237_v39 = vld [vmem:[#allocation2 + $0x518] sm:$0xff]  ;;  %v172_v40 = vld [vmem:[#allocation2 + $0x310] sm:$0xff] }
  0x60   :  { %345 = vmatpush2.msra.mxu0 %v150_v53  ;;  %467 = vmatpush1.msra.mxu1 %v88_v54  ;;  %v236_v41 = vld [vmem:[#allocation2 + $0x510] sm:$0xff]  ;;  %v169_v42 = vld [vmem:[#allocation2 + $0x2f8] sm:$0xff] }
  0x61   :  { %346 = vmatprep.subr.mxu0 %v147_v55  ;;  %468 = vmatprep.subr.mxu1 %v85_v56  ;;  %v233_v43 = vld [vmem:[#allocation2 + $0x4f8] sm:$0xff]  ;;  %v168_v44 = vld [vmem:[#allocation2 + $0x2f0] sm:$0xff] }
  0x62   :  { %347 = vmatpush2.msra.mxu0 %v146_v57  ;;  %469 = vmatpush1.msra.mxu1 %v84_v58  ;;  %v232_v45 = vld [vmem:[#allocation2 + $0x4f0] sm:$0xff]  ;;  %v165_v46 = vld [vmem:[#allocation2 + $0x2d8] sm:$0xff] }
  0x63   :  { %348 = vmatprep.subr.mxu0 %v143_v59  ;;  %470 = vmatprep.subr.mxu1 %v81_v60  ;;  %v229_v47 = vld [vmem:[#allocation2 + $0x4d8] sm:$0xff]  ;;  %v164_v48 = vld [vmem:[#allocation2 + $0x2d0] sm:$0xff] }
  0x64   :  { %349 = vmatpush2.msra.mxu0 %v142_v61  ;;  %471 = vmatpush1.msra.mxu1 %v80_v62  ;;  %v228_v49 = vld [vmem:[#allocation2 + $0x4d0] sm:$0xff]  ;;  %v161_v50 = vld [vmem:[#allocation2 + $0x2b8] sm:$0xff] }
  0x65   :  { %350 = vmatprep.subr.mxu0 %v139_v63  ;;  %472 = vmatprep.subr.mxu1 %v77_v1  ;;  %v225_v51 = vld [vmem:[#allocation2 + $0x4b8] sm:$0xff]  ;;  %v160_v52 = vld [vmem:[#allocation2 + $0x2b0] sm:$0xff] }
  0x66   :  { %351 = vmatpush2.msra.mxu0 %v138_v2  ;;  %352 = vmatprep.mubr.f32.mxu0 %v1978_v4  ;;  %v224_v53 = vld [vmem:[#allocation2 + $0x4b0] sm:$0xff]  ;;  %v157_v54 = vld [vmem:[#allocation2 + $0x298] sm:$0xff] }
  0x67   :  { %473 = vmatpush1.msra.mxu1 %v76_v5  ;;  %353 = vmatmul.mubr.f32.vlgmr.msra.gmra.mxu0 %v1983_v6  ;;  %v221_v55 = vld [vmem:[#allocation2 + $0x498] sm:$0xff]  ;;  %v156_v56 = vld [vmem:[#allocation2 + $0x290] sm:$0xff] }
  0x68   :  { %474 = vmatprep.subr.mxu1 %v201_v7  ;;  %519 = vmatprep.subr.mxu0 %v265_v8  ;;  %v220_v57 = vld [vmem:[#allocation2 + $0x490] sm:$0xff]  ;;  %v153_v58 = vld [vmem:[#allocation2 + $0x278] sm:$0xff] }
  0x69   :  { %475 = vmatpush2.msra.mxu1 %v200_v9  ;;  %520 = vmatpush1.msra.mxu0 %v264_v10  ;;  %v217_v59 = vld [vmem:[#allocation2 + $0x478] sm:$0xff]  ;;  %v152_v60 = vld [vmem:[#allocation2 + $0x270] sm:$0xff] }
  0x6a   :  { %476 = vmatprep.subr.mxu1 %v197_v11  ;;  %521 = vmatprep.subr.mxu0 %v261_v12  ;;  %v216_v61 = vld [vmem:[#allocation2 + $0x470] sm:$0xff]  ;;  %v149_v62 = vld [vmem:[#allocation2 + $0x258] sm:$0xff] }
  0x6b   :  { %358 = vmatprep.mubr.f32.mxu0 %v1990_v13  ;;  %477 = vmatpush2.msra.mxu1 %v196_v14  ;;  %v213_v63 = vld [vmem:[#allocation2 + $0x458] sm:$0xff]  ;;  %v148_v1 = vld [vmem:[#allocation2 + $0x250] sm:$0xff] }
  0x6c   :  { %522 = vmatpush1.msra.mxu0 %v260_v15  ;;  %478 = vmatprep.subr.mxu1 %v193_v17  ;;  %v212_v2 = vld [vmem:[#allocation2 + $0x450] sm:$0xff]  ;;  %v145_v5 = vld [vmem:[#allocation2 + $0x238] sm:$0xff]  ;;  %v665_v15 = vld [vmem:[#allocation5 + $0x1e8] sm:$0xff] }
  0x6d   :  { %359 = vmatmul.mubr.f32.gmra.mxu0 %v1995_v16  ;;  %523 = vmatprep.subr.mxu0 %v257_v18  ;;  %v209_v7 = vld [vmem:[#allocation2 + $0x438] sm:$0xff]  ;;  %v144_v8 = vld [vmem:[#allocation2 + $0x230] sm:$0xff]  ;;  %v664_v17 = vld [vmem:[#allocation5 + $0x1e0] sm:$0xff] }
  0x6e   :  { %435 = vmatprep.mubr.f32.mxu1 %v1908_v0  ;;  %479 = vmatpush2.msra.mxu1 %v192_v19  ;;  %v208_v9 = vld [vmem:[#allocation2 + $0x430] sm:$0xff]  ;;  %v141_v10 = vld [vmem:[#allocation2 + $0x218] sm:$0xff]  ;;  %v793_v18 = vld [vmem:[#allocation5 + $0x5e8] sm:$0xff] }
  0x6f   :  { %524 = vmatpush1.msra.mxu0 %v256_v20  ;;  %436 = vmatmul.mubr.f32.gmra.mxu1 %v2002_v21  ;;  %v205_v11 = vld [vmem:[#allocation2 + $0x418] sm:$0xff]  ;;  %v140_v12 = vld [vmem:[#allocation2 + $0x210] sm:$0xff]  ;;  %v661_v19 = vld [vmem:[#allocation5 + $0x1c8] sm:$0xff] }
  0x70   :  { %480 = vmatprep.subr.mxu1 %v189_v22  ;;  %525 = vmatprep.subr.mxu0 %v253_v23  ;;  %v204_v14 = vld [vmem:[#allocation2 + $0x410] sm:$0xff]  ;;  %v792_v20 = vld [vmem:[#allocation5 + $0x5e0] sm:$0xff]  ;;  %v657_v23 = vld [vmem:[#allocation5 + $0x1a8] sm:$0xff] }
  0x71   :  { %481 = vmatpush2.msra.mxu1 %v188_v24  ;;  %526 = vmatpush1.msra.mxu0 %v252_v25  ;;  %v660_v22 = vld [vmem:[#allocation5 + $0x1c0] sm:$0xff] }
  0x72   :  { %482 = vmatprep.subr.mxu1 %v185_v26  ;;  %527 = vmatprep.subr.mxu0 %v249_v27  ;;  %v656_v24 = vld [vmem:[#allocation5 + $0x1a0] sm:$0xff]  ;;  %v781_v26 = vld [vmem:[#allocation5 + $0x588] sm:$0xff] }
  0x73   :  { %483 = vmatpush2.msra.mxu1 %v184_v28  ;;  %528 = vmatpush1.msra.mxu0 %v248_v29  ;;  %v652_v25 = vld [vmem:[#allocation5 + $0x180] sm:$0xff]  ;;  %v649_v27 = vld [vmem:[#allocation5 + $0x168] sm:$0xff] }
  0x74   :  { %484 = vmatprep.subr.mxu1 %v181_v30  ;;  %529 = vmatprep.subr.mxu0 %v245_v31  ;;  %v648_v28 = vld [vmem:[#allocation5 + $0x160] sm:$0xff]  ;;  %v777_v29 = vld [vmem:[#allocation5 + $0x568] sm:$0xff] }
  0x75   :  { %485 = vmatpush2.msra.mxu1 %v180_v32  ;;  %530 = vmatpush1.msra.mxu0 %v244_v33  ;;  %v776_v30 = vld [vmem:[#allocation5 + $0x560] sm:$0xff]  ;;  %v773_v32 = vld [vmem:[#allocation5 + $0x548] sm:$0xff] }
  0x76   :  { %486 = vmatprep.subr.mxu1 %v177_v34  ;;  %531 = vmatprep.subr.mxu0 %v241_v35  ;;  %v644_v31 = vld [vmem:[#allocation5 + $0x140] sm:$0xff]  ;;  %v641_v33 = vld [vmem:[#allocation5 + $0x128] sm:$0xff] }
  0x77   :  { %487 = vmatpush2.msra.mxu1 %v176_v36  ;;  %532 = vmatpush1.msra.mxu0 %v240_v37  ;;  %v772_v34 = vld [vmem:[#allocation5 + $0x540] sm:$0xff]  ;;  %v769_v36 = vld [vmem:[#allocation5 + $0x528] sm:$0xff] }
  0x78   :  { %488 = vmatprep.subr.mxu1 %v173_v38  ;;  %533 = vmatprep.subr.mxu0 %v237_v39  ;;  %v640_v35 = vld [vmem:[#allocation5 + $0x120] sm:$0xff]  ;;  %v637_v37 = vld [vmem:[#allocation5 + $0x108] sm:$0xff] }
  0x79   :  { %489 = vmatpush2.msra.mxu1 %v172_v40  ;;  %534 = vmatpush1.msra.mxu0 %v236_v41  ;;  %v768_v38 = vld [vmem:[#allocation5 + $0x520] sm:$0xff]  ;;  %v765_v40 = vld [vmem:[#allocation5 + $0x508] sm:$0xff] }
  0x7a   :  { %490 = vmatprep.subr.mxu1 %v169_v42  ;;  %535 = vmatprep.subr.mxu0 %v233_v43  ;;  %v636_v39 = vld [vmem:[#allocation5 + $0x100] sm:$0xff]  ;;  %v633_v41 = vld [vmem:[#allocation5 + $0xe8] sm:$0xff] }
  0x7b   :  { %491 = vmatpush2.msra.mxu1 %v168_v44  ;;  %536 = vmatpush1.msra.mxu0 %v232_v45  ;;  %v764_v42 = vld [vmem:[#allocation5 + $0x500] sm:$0xff]  ;;  %v761_v44 = vld [vmem:[#allocation5 + $0x4e8] sm:$0xff] }
  0x7c   :  { %492 = vmatprep.subr.mxu1 %v165_v46  ;;  %537 = vmatprep.subr.mxu0 %v229_v47  ;;  %v632_v43 = vld [vmem:[#allocation5 + $0xe0] sm:$0xff]  ;;  %v629_v45 = vld [vmem:[#allocation5 + $0xc8] sm:$0xff] }
  0x7d   :  { %493 = vmatpush2.msra.mxu1 %v164_v48  ;;  %538 = vmatpush1.msra.mxu0 %v228_v49  ;;  %v760_v46 = vld [vmem:[#allocation5 + $0x4e0] sm:$0xff]  ;;  %v757_v48 = vld [vmem:[#allocation5 + $0x4c8] sm:$0xff] }
  0x7e   :  { %494 = vmatprep.subr.mxu1 %v161_v50  ;;  %539 = vmatprep.subr.mxu0 %v225_v51  ;;  %v628_v47 = vld [vmem:[#allocation5 + $0xc0] sm:$0xff]  ;;  %v625_v49 = vld [vmem:[#allocation5 + $0xa8] sm:$0xff] }
  0x7f   :  { %495 = vmatpush2.msra.mxu1 %v160_v52  ;;  %540 = vmatpush1.msra.mxu0 %v224_v53  ;;  %v756_v50 = vld [vmem:[#allocation5 + $0x4c0] sm:$0xff]  ;;  %v753_v52 = vld [vmem:[#allocation5 + $0x4a8] sm:$0xff] }
  0x80   :  { %496 = vmatprep.subr.mxu1 %v157_v54  ;;  %541 = vmatprep.subr.mxu0 %v221_v55  ;;  %v624_v51 = vld [vmem:[#allocation5 + $0xa0] sm:$0xff]  ;;  %v621_v53 = vld [vmem:[#allocation5 + $0x88] sm:$0xff] }
  0x81   :  { %497 = vmatpush2.msra.mxu1 %v156_v56  ;;  %542 = vmatpush1.msra.mxu0 %v220_v57  ;;  %v752_v54 = vld [vmem:[#allocation5 + $0x4a0] sm:$0xff]  ;;  %v749_v56 = vld [vmem:[#allocation5 + $0x488] sm:$0xff] }
  0x82   :  { %498 = vmatprep.subr.mxu1 %v153_v58  ;;  %543 = vmatprep.subr.mxu0 %v217_v59  ;;  %v620_v55 = vld [vmem:[#allocation5 + $0x80] sm:$0xff]  ;;  %v617_v57 = vld [vmem:[#allocation5 + $0x68] sm:$0xff] }
  0x83   :  { %499 = vmatpush2.msra.mxu1 %v152_v60  ;;  %544 = vmatpush1.msra.mxu0 %v216_v61  ;;  %v616_v58 = vld [vmem:[#allocation5 + $0x60] sm:$0xff]  ;;  %v613_v59 = vld [vmem:[#allocation5 + $0x48] sm:$0xff] }
  0x84   :  { %500 = vmatprep.subr.mxu1 %v149_v62  ;;  %545 = vmatprep.subr.mxu0 %v213_v63  ;;  %v612_v60 = vld [vmem:[#allocation5 + $0x40] sm:$0xff]  ;;  %v609_v61 = vld [vmem:[#allocation5 + $0x28] sm:$0xff] }
  0x85   :  { %501 = vmatpush2.msra.mxu1 %v148_v1  ;;  %546 = vmatpush1.msra.mxu0 %v212_v2  ;;  %v608_v62 = vld [vmem:[#allocation5 + $0x20] sm:$0xff]  ;;  %v605_v63 = vld [vmem:[#allocation5 + $0x8] sm:$0xff] }
  0x86   :  { %502 = vmatprep.subr.mxu1 %v145_v5  ;;  %547 = vmatprep.subr.mxu0 %v209_v7  ;;  %v604_v1 = vld [vmem:[#allocation5] sm:$0xff]  ;;  %v729_v2 = vld [vmem:[#allocation5 + $0x3e8] sm:$0xff] }
  0x87   :  { %503 = vmatpush2.msra.mxu1 %v144_v8  ;;  %548 = vmatpush1.msra.mxu0 %v208_v9  ;;  %v748_v5 = vld [vmem:[#allocation5 + $0x480] sm:$0xff]  ;;  %v745_v8 = vld [vmem:[#allocation5 + $0x468] sm:$0xff] }
  0x88   :  { %504 = vmatprep.subr.mxu1 %v141_v10  ;;  %549 = vmatprep.subr.mxu0 %v205_v11  ;;  %v728_v7 = vld [vmem:[#allocation5 + $0x3e0] sm:$0xff]  ;;  %v725_v9 = vld [vmem:[#allocation5 + $0x3c8] sm:$0xff] }
  0x89   :  { %505 = vmatpush2.msra.mxu1 %v140_v12  ;;  %506 = vmatprep.mubr.f32.mxu1 %v1978_v4  ;;  %v789_v4 = vld [vmem:[#allocation5 + $0x5c8] sm:$0xff]  ;;  %v744_v10 = vld [vmem:[#allocation5 + $0x460] sm:$0xff] }
  0x8a   :  { %550 = vmatpush1.msra.mxu0 %v204_v14  ;;  %583 = vmatprep.mubr.f32.mxu0 %v1908_v0  ;;  %v724_v11 = vld [vmem:[#allocation5 + $0x3c0] sm:$0xff]  ;;  %v741_v12 = vld [vmem:[#allocation5 + $0x448] sm:$0xff] }
  0x8b   :  { %507 = vmatmul.mubr.f32.vlgmr.msra.gmra.mxu1 %v1983_v6  ;;  %584 = vmatmul.mubr.f32.vlgmr.msra.gmra.mxu0 %v1972_v3  ;;  %v788_v6 = vld [vmem:[#allocation5 + $0x5c0] sm:$0xff]  ;;  %v785_v3 = vld [vmem:[#allocation5 + $0x5a8] sm:$0xff] }
  0x8c   :  { %512 = vmatprep.mubr.f32.mxu1 %v1990_v13  ;;  %589 = vmatprep.mubr.f32.mxu0 %v1908_v0  ;;  %v653_v13 = vld [vmem:[#allocation5 + $0x188] sm:$0xff]  ;;  %v784_v0 = vld [vmem:[#allocation5 + $0x5a0] sm:$0xff] }
  0x8d   :  { %882 = vmatprep.subr.mxu0 %v665_v15  ;;  %959 = vmatprep.subr.mxu1 %v793_v18  ;;  %v721_v14 = vld [vmem:[#allocation5 + $0x3a8] sm:$0xff]  ;;  %v740_v15 = vld [vmem:[#allocation5 + $0x440] sm:$0xff] }
  0x8e   :  { %883 = vmatpush1.msra.mxu0 %v664_v17  ;;  %960 = vmatpush1.msra.mxu1 %v792_v20  ;;  %v720_v17 = vld [vmem:[#allocation5 + $0x3a0] sm:$0xff]  ;;  %v737_v18 = vld [vmem:[#allocation5 + $0x428] sm:$0xff] }
  0x8f   :  { %513 = vmatmul.mubr.f32.gmra.mxu1 %v1995_v16  ;;  %884 = vmatprep.subr.mxu0 %v661_v19  ;;  %v780_v16 = vld [vmem:[#allocation5 + $0x580] sm:$0xff]  ;;  %v717_v19 = vld [vmem:[#allocation5 + $0x388] sm:$0xff] }
  0x90   :  { %590 = vmatmul.mubr.f32.gmra.mxu0 %v2002_v21  ;;  %961 = vmatprep.subr.mxu1 %v789_v4  ;;  %v645_v21 = vld [vmem:[#allocation5 + $0x148] sm:$0xff]  ;;  %v736_v20 = vld [vmem:[#allocation5 + $0x420] sm:$0xff] }
  0x91   :  { %885 = vmatpush1.msra.mxu0 %v660_v22  ;;  %962 = vmatpush1.msra.mxu1 %v788_v6  ;;  %v716_v22 = vld [vmem:[#allocation5 + $0x380] sm:$0xff]  ;;  %v733_v4 = vld [vmem:[#allocation5 + $0x408] sm:$0xff] }
  0x92   :  { %886 = vmatprep.subr.mxu0 %v657_v23  ;;  %963 = vmatprep.subr.mxu1 %v785_v3  ;;  %v713_v23 = vld [vmem:[#allocation5 + $0x368] sm:$0xff]  ;;  %v732_v6 = vld [vmem:[#allocation5 + $0x400] sm:$0xff] }
  0x93   :  { %887 = vmatpush1.msra.mxu0 %v656_v24  ;;  %964 = vmatpush1.msra.mxu1 %v784_v0  ;;  %v712_v24 = vld [vmem:[#allocation5 + $0x360] sm:$0xff]  ;;  %v857_v3 = vld [vmem:[#allocation5 + $0x7e8] sm:$0xff] }
  0x94   :  { %888 = vmatprep.subr.mxu0 %v653_v13  ;;  %965 = vmatprep.subr.mxu1 %v781_v26  ;;  %v709_v13 = vld [vmem:[#allocation5 + $0x348] sm:$0xff]  ;;  %v856_v0 = vld [vmem:[#allocation5 + $0x7e0] sm:$0xff] }
  0x95   :  { %889 = vmatpush1.msra.mxu0 %v652_v25  ;;  %966 = vmatpush1.msra.mxu1 %v780_v16  ;;  %v853_v25 = vld [vmem:[#allocation5 + $0x7c8] sm:$0xff]  ;;  %v708_v26 = vld [vmem:[#allocation5 + $0x340] sm:$0xff] }
  0x96   :  { %890 = vmatprep.subr.mxu0 %v649_v27  ;;  %967 = vmatprep.subr.mxu1 %v777_v29  ;;  %v852_v27 = vld [vmem:[#allocation5 + $0x7c0] sm:$0xff]  ;;  %v705_v16 = vld [vmem:[#allocation5 + $0x328] sm:$0xff] }
  0x97   :  { %891 = vmatpush1.msra.mxu0 %v648_v28  ;;  %968 = vmatpush1.msra.mxu1 %v776_v30  ;;  %v849_v28 = vld [vmem:[#allocation5 + $0x7a8] sm:$0xff]  ;;  %v704_v29 = vld [vmem:[#allocation5 + $0x320] sm:$0xff] }
  0x98   :  { %892 = vmatprep.subr.mxu0 %v645_v21  ;;  %969 = vmatprep.subr.mxu1 %v773_v32  ;;  %v848_v21 = vld [vmem:[#allocation5 + $0x7a0] sm:$0xff]  ;;  %v845_v30 = vld [vmem:[#allocation5 + $0x788] sm:$0xff] }
  0x99   :  { %893 = vmatpush1.msra.mxu0 %v644_v31  ;;  %970 = vmatpush1.msra.mxu1 %v772_v34  ;;  %v701_v31 = vld [vmem:[#allocation5 + $0x308] sm:$0xff]  ;;  %v844_v32 = vld [vmem:[#allocation5 + $0x780] sm:$0xff] }
  0x9a   :  { %894 = vmatprep.subr.mxu0 %v641_v33  ;;  %971 = vmatprep.subr.mxu1 %v769_v36  ;;  %v700_v33 = vld [vmem:[#allocation5 + $0x300] sm:$0xff]  ;;  %v841_v34 = vld [vmem:[#allocation5 + $0x768] sm:$0xff] }
  0x9b   :  { %895 = vmatpush1.msra.mxu0 %v640_v35  ;;  %972 = vmatpush1.msra.mxu1 %v768_v38  ;;  %v697_v35 = vld [vmem:[#allocation5 + $0x2e8] sm:$0xff]  ;;  %v840_v36 = vld [vmem:[#allocation5 + $0x760] sm:$0xff] }
  0x9c   :  { %896 = vmatprep.subr.mxu0 %v637_v37  ;;  %973 = vmatprep.subr.mxu1 %v765_v40  ;;  %v696_v37 = vld [vmem:[#allocation5 + $0x2e0] sm:$0xff]  ;;  %v837_v38 = vld [vmem:[#allocation5 + $0x748] sm:$0xff] }
  0x9d   :  { %897 = vmatpush1.msra.mxu0 %v636_v39  ;;  %974 = vmatpush1.msra.mxu1 %v764_v42  ;;  %v693_v39 = vld [vmem:[#allocation5 + $0x2c8] sm:$0xff]  ;;  %v836_v40 = vld [vmem:[#allocation5 + $0x740] sm:$0xff] }
  0x9e   :  { %898 = vmatprep.subr.mxu0 %v633_v41  ;;  %975 = vmatprep.subr.mxu1 %v761_v44  ;;  %v692_v41 = vld [vmem:[#allocation5 + $0x2c0] sm:$0xff]  ;;  %v833_v42 = vld [vmem:[#allocation5 + $0x728] sm:$0xff] }
  0x9f   :  { %899 = vmatpush1.msra.mxu0 %v632_v43  ;;  %976 = vmatpush1.msra.mxu1 %v760_v46  ;;  %v689_v43 = vld [vmem:[#allocation5 + $0x2a8] sm:$0xff]  ;;  %v832_v44 = vld [vmem:[#allocation5 + $0x720] sm:$0xff] }
  0xa0   :  { %900 = vmatprep.subr.mxu0 %v629_v45  ;;  %977 = vmatprep.subr.mxu1 %v757_v48  ;;  %v688_v45 = vld [vmem:[#allocation5 + $0x2a0] sm:$0xff]  ;;  %v829_v46 = vld [vmem:[#allocation5 + $0x708] sm:$0xff] }
  0xa1   :  { %901 = vmatpush1.msra.mxu0 %v628_v47  ;;  %978 = vmatpush1.msra.mxu1 %v756_v50  ;;  %v685_v47 = vld [vmem:[#allocation5 + $0x288] sm:$0xff]  ;;  %v828_v48 = vld [vmem:[#allocation5 + $0x700] sm:$0xff] }
  0xa2   :  { %902 = vmatprep.subr.mxu0 %v625_v49  ;;  %979 = vmatprep.subr.mxu1 %v753_v52  ;;  %v684_v49 = vld [vmem:[#allocation5 + $0x280] sm:$0xff]  ;;  %v825_v50 = vld [vmem:[#allocation5 + $0x6e8] sm:$0xff] }
  0xa3   :  { %903 = vmatpush1.msra.mxu0 %v624_v51  ;;  %980 = vmatpush1.msra.mxu1 %v752_v54  ;;  %v681_v51 = vld [vmem:[#allocation5 + $0x268] sm:$0xff]  ;;  %v824_v52 = vld [vmem:[#allocation5 + $0x6e0] sm:$0xff] }
  0xa4   :  { %904 = vmatprep.subr.mxu0 %v621_v53  ;;  %981 = vmatprep.subr.mxu1 %v749_v56  ;;  %v680_v53 = vld [vmem:[#allocation5 + $0x260] sm:$0xff]  ;;  %v821_v54 = vld [vmem:[#allocation5 + $0x6c8] sm:$0xff] }
  0xa5   :  { %905 = vmatpush1.msra.mxu0 %v620_v55  ;;  %982 = vmatpush1.msra.mxu1 %v748_v5  ;;  %v677_v55 = vld [vmem:[#allocation5 + $0x248] sm:$0xff]  ;;  %v820_v56 = vld [vmem:[#allocation5 + $0x6c0] sm:$0xff] }
  0xa6   :  { %906 = vmatprep.subr.mxu0 %v617_v57  ;;  %983 = vmatprep.subr.mxu1 %v745_v8  ;;  %v676_v57 = vld [vmem:[#allocation5 + $0x240] sm:$0xff] }
  0xa7   :  { %907 = vmatpush1.msra.mxu0 %v616_v58  ;;  %984 = vmatpush1.msra.mxu1 %v744_v10  ;;  %v817_v58 = vld [vmem:[#allocation5 + $0x6a8] sm:$0xff]  ;;  %v812_v5 = vld [vmem:[#allocation5 + $0x680] sm:$0xff] }
  0xa8   :  { %908 = vmatprep.subr.mxu0 %v613_v59  ;;  %985 = vmatprep.subr.mxu1 %v741_v12  ;;  %v673_v59 = vld [vmem:[#allocation5 + $0x228] sm:$0xff]  ;;  %v808_v8 = vld [vmem:[#allocation5 + $0x660] sm:$0xff] }
  0xa9   :  { %909 = vmatpush1.msra.mxu0 %v612_v60  ;;  %986 = vmatpush1.msra.mxu1 %v740_v15  ;;  %v816_v60 = vld [vmem:[#allocation5 + $0x6a0] sm:$0xff] }
  0xaa   :  { %910 = vmatprep.subr.mxu0 %v609_v61  ;;  %987 = vmatprep.subr.mxu1 %v737_v18  ;;  %v672_v61 = vld [vmem:[#allocation5 + $0x220] sm:$0xff]  ;;  %v268_v18 = vlaneseq }
  0xab   :  { %911 = vmatpush1.msra.mxu0 %v608_v62  ;;  %988 = vmatpush1.msra.mxu1 %v736_v20  ;;  %v813_v62 = vld [vmem:[#allocation5 + $0x688] sm:$0xff]  ;;  %v804_v10 = vld [vmem:[#allocation5 + $0x640] sm:$0xff] }
  0xac   :  { %912 = vmatprep.subr.mxu0 %v605_v63  ;;  %989 = vmatprep.subr.mxu1 %v733_v4  ;;  %v669_v63 = vld [vmem:[#allocation5 + $0x208] sm:$0xff]  ;;  %v800_v12 = vld [vmem:[#allocation5 + $0x620] sm:$0xff] }
  0xad   :  { %913 = vmatpush1.msra.mxu0 %v604_v1  ;;  %990 = vmatpush1.msra.mxu1 %v732_v6  ;;  %v668_v1 = vld [vmem:[#allocation5 + $0x200] sm:$0xff] }
  0xae   :  { %914 = vmatprep.subr.mxu0 %v729_v2  ;;  %991 = vmatprep.subr.mxu1 %v857_v3  ;;  %v667_v2 = vld [vmem:[#allocation5 + $0x1f8] sm:$0xff]  ;;  %v796_v15 = vld [vmem:[#allocation5 + $0x600] sm:$0xff] }
  0xaf   :  { %915 = vmatpush2.msra.mxu0 %v728_v7  ;;  %992 = vmatpush2.msra.mxu1 %v856_v0  ;;  %v809_v7 = vld [vmem:[#allocation5 + $0x668] sm:$0xff] }
  0xb0   :  { %916 = vmatprep.subr.mxu0 %v725_v9  ;;  %993 = vmatprep.subr.mxu1 %v853_v25  ;;  %v805_v9 = vld [vmem:[#allocation5 + $0x648] sm:$0xff] }
  0xb1   :  { %917 = vmatpush2.msra.mxu0 %v724_v11  ;;  %994 = vmatpush2.msra.mxu1 %v852_v27  ;;  %v801_v11 = vld [vmem:[#allocation5 + $0x628] sm:$0xff] }
  0xb2   :  { %918 = vmatprep.subr.mxu0 %v721_v14  ;;  %995 = vmatprep.subr.mxu1 %v849_v28  ;;  %v797_v14 = vld [vmem:[#allocation5 + $0x608] sm:$0xff] }
  0xb3   :  { %919 = vmatpush2.msra.mxu0 %v720_v17  ;;  %996 = vmatpush2.msra.mxu1 %v848_v21  ;;  %v795_v17 = vld [vmem:[#allocation5 + $0x5f8] sm:$0xff] }
  0xb4   :  { %920 = vmatprep.subr.mxu0 %v717_v19  ;;  %997 = vmatprep.subr.mxu1 %v845_v30  ;;  %v2014_v19 = vshrl.u32 %v268_v18, 7  ;;  %v607_v18 = vld [vmem:[#allocation5 + $0x18] sm:$0xff] }
  0xb5   :  { %921 = vmatpush2.msra.mxu0 %v716_v22  ;;  %998 = vmatpush2.msra.mxu1 %v844_v32  ;;  %v2022_v22 = vld [vmem:[%s2153_s2] sm:$0xf] }
  0xb6   :  { %922 = vmatprep.subr.mxu0 %v713_v23  ;;  %999 = vmatprep.subr.mxu1 %v841_v34  ;;  %v2017_v20 = vsub.s32 0, %v2014_v19  ;;  %v2025_v4 = vsub.s32 1, %v2014_v19  ;;  %v666_v34 = vld [vmem:[#allocation5 + $0x1f0] sm:$0xff] }
  0xb7   :  { %923 = vmatpush2.msra.mxu0 %v712_v24  ;;  %1000 = vmatpush2.msra.mxu1 %v840_v36  ;;  %v663_v36 = vld [vmem:[#allocation5 + $0x1d8] sm:$0xff] }
  0xb8   :  { %924 = vmatprep.subr.mxu0 %v709_v13  ;;  %1001 = vmatprep.subr.mxu1 %v837_v38  ;;  %v271_v23 = vrot.slane %v2022_v22, %v2017_v20  ;;  %v275_v6 = vrot.slane %v2022_v22, %v2025_v4  ;;  %v662_v38 = vld [vmem:[#allocation5 + $0x1d0] sm:$0xff] }
  0xb9   :  { %925 = vmatpush2.msra.mxu0 %v708_v26  ;;  %1002 = vmatpush2.msra.mxu1 %v836_v40  ;;  %v659_v40 = vld [vmem:[#allocation5 + $0x1b8] sm:$0xff] }
  0xba   :  { %926 = vmatprep.subr.mxu0 %v705_v16  ;;  %1003 = vmatprep.subr.mxu1 %v833_v42  ;;  %v658_v42 = vld [vmem:[#allocation5 + $0x1b0] sm:$0xff] }
  0xbb   :  { %927 = vmatpush2.msra.mxu0 %v704_v29  ;;  %1004 = vmatpush2.msra.mxu1 %v832_v44  ;;  %v655_v44 = vld [vmem:[#allocation5 + $0x198] sm:$0xff] }
  0xbc   :  { %928 = vmatprep.subr.mxu0 %v701_v31  ;;  %1005 = vmatprep.subr.mxu1 %v829_v46  ;;  %v651_v46 = vld [vmem:[#allocation5 + $0x178] sm:$0xff] }
  0xbd   :  { %929 = vmatpush2.msra.mxu0 %v700_v33  ;;  %1006 = vmatpush2.msra.mxu1 %v828_v48  ;;  %v647_v48 = vld [vmem:[#allocation5 + $0x158] sm:$0xff] }
  0xbe   :  { %930 = vmatprep.subr.mxu0 %v697_v35  ;;  %1007 = vmatprep.subr.mxu1 %v825_v50  ;;  %v643_v50 = vld [vmem:[#allocation5 + $0x138] sm:$0xff] }
  0xbf   :  { %931 = vmatpush2.msra.mxu0 %v696_v37  ;;  %1008 = vmatpush2.msra.mxu1 %v824_v52  ;;  %v639_v52 = vld [vmem:[#allocation5 + $0x118] sm:$0xff] }
  0xc0   :  { %932 = vmatprep.subr.mxu0 %v693_v39  ;;  %1009 = vmatprep.subr.mxu1 %v821_v54  ;;  %v635_v54 = vld [vmem:[#allocation5 + $0xf8] sm:$0xff] }
  0xc1   :  { %933 = vmatpush2.msra.mxu0 %v692_v41  ;;  %1010 = vmatpush2.msra.mxu1 %v820_v56  ;;  %v631_v56 = vld [vmem:[#allocation5 + $0xd8] sm:$0xff] }
  0xc2   :  { %934 = vmatprep.subr.mxu0 %v689_v43  ;;  %1011 = vmatprep.subr.mxu1 %v817_v58  ;;  %v627_v58 = vld [vmem:[#allocation5 + $0xb8] sm:$0xff] }
  0xc3   :  { %935 = vmatpush2.msra.mxu0 %v688_v45  ;;  %1012 = vmatpush2.msra.mxu1 %v816_v60  ;;  %v654_v45 = vld [vmem:[#allocation5 + $0x190] sm:$0xff]  ;;  %v2047_v60 = vsub.s32 2, %v2014_v19 }
  0xc4   :  { %936 = vmatprep.subr.mxu0 %v685_v47  ;;  %1013 = vmatprep.subr.mxu1 %v813_v62  ;;  %v650_v47 = vld [vmem:[#allocation5 + $0x170] sm:$0xff] }
  0xc5   :  { %937 = vmatpush2.msra.mxu0 %v684_v49  ;;  %1014 = vmatpush2.msra.mxu1 %v812_v5  ;;  %v646_v49 = vld [vmem:[#allocation5 + $0x150] sm:$0xff] }
  0xc6   :  { %938 = vmatprep.subr.mxu0 %v681_v51  ;;  %1015 = vmatprep.subr.mxu1 %v809_v7  ;;  %v642_v51 = vld [vmem:[#allocation5 + $0x130] sm:$0xff]  ;;  %v615_v7 = vld [vmem:[#allocation5 + $0x58] sm:$0xff] }
  0xc7   :  { %939 = vmatpush2.msra.mxu0 %v680_v53  ;;  %1016 = vmatpush2.msra.mxu1 %v808_v8  ;;  %v638_v53 = vld [vmem:[#allocation5 + $0x110] sm:$0xff] }
  0xc8   :  { %940 = vmatprep.subr.mxu0 %v677_v55  ;;  %1017 = vmatprep.subr.mxu1 %v805_v9  ;;  %v634_v55 = vld [vmem:[#allocation5 + $0xf0] sm:$0xff] }
  0xc9   :  { %941 = vmatpush2.msra.mxu0 %v676_v57  ;;  %1018 = vmatpush2.msra.mxu1 %v804_v10  ;;  %v630_v57 = vld [vmem:[#allocation5 + $0xd0] sm:$0xff] }
  0xca   :  { %942 = vmatprep.subr.mxu0 %v673_v59  ;;  %1019 = vmatprep.subr.mxu1 %v801_v11  ;;  %v626_v59 = vld [vmem:[#allocation5 + $0xb0] sm:$0xff]  ;;  %v611_v11 = vld [vmem:[#allocation5 + $0x38] sm:$0xff] }
  0xcb   :  { %943 = vmatpush2.msra.mxu0 %v672_v61  ;;  %1020 = vmatpush2.msra.mxu1 %v800_v12  ;;  %v623_v61 = vld [vmem:[#allocation5 + $0x98] sm:$0xff]  ;;  %v622_v62 = vld [vmem:[#allocation5 + $0x90] sm:$0xff] }
  0xcc   :  { %944 = vmatprep.subr.mxu0 %v669_v63  ;;  %1021 = vmatprep.subr.mxu1 %v797_v14  ;;  %v2050_v63 = vsub.s32 3, %v2014_v19  ;;  %v618_v5 = vld [vmem:[#allocation5 + $0x70] sm:$0xff] }
  0xcd   :  { %945 = vmatpush2.msra.mxu0 %v668_v1  ;;  %1022 = vmatpush2.msra.mxu1 %v796_v15  ;;  %v619_v1 = vld [vmem:[#allocation5 + $0x78] sm:$0xff]  ;;  %v614_v9 = vld [vmem:[#allocation5 + $0x50] sm:$0xff] }
  0xce   :  { %1036 = vmatprep.subr.mxu0 %v667_v2  ;;  %1113 = vmatprep.subr.mxu1 %v795_v17  ;;  %v279_v2 = vrot.slane %v2022_v22, %v2047_v60  ;;  %v283_v8 = vrot.slane %v2022_v22, %v2050_v63  ;;  %v610_v15 = vld [vmem:[#allocation5 + $0x30] sm:$0xff]  ;;  %v731_v22 = vld [vmem:[#allocation5 + $0x3f8] sm:$0xff] }
 0x107   :  { %v431_v24 = vpop.f32.mrf.mxu1 }
 0x109   :  { %v433_v26 = vpop.f32.mrf.mxu1 }
 0x127   :  { %v354_v3 = vpop.f32.mrf.mxu0 }
 0x128   :  { %v355_v13 = vadd.f32 %v354_v3, %v271_v23 }
 0x129   :  { %v356_v0 = vpop.f32.mrf.mxu0 }
 0x12a   :  { %v357_v25 = vadd.f32 %v356_v0, %v275_v6  ;;  %v2031_v27 = vadd.f32 %v431_v24, %v355_v13 }
 0x12c   :  { %v434_v16 = vadd.f32 %v433_v26, %v357_v25  ;;  %v596_v31 = vmax.f32 %v2031_v27, 0.0  ;;  %v730_v26 = vld [vmem:[#allocation5 + $0x3f0] sm:$0xff] }
 0x12d   :  { %v360_v28 = vpop.f32.mrf.mxu0  ;;  %v846_v27 = vld [vmem:[#allocation5 + $0x790] sm:$0xff] }
 0x12e   :  { %v361_v29 = vadd.f32 %v360_v28, %v271_v23  ;;  %v597_v21 = vmax.f32 %v434_v16, 0.0  ;;  %v727_v28 = vld [vmem:[#allocation5 + $0x3d8] sm:$0xff] }
 0x12f   :  { %v362_v30 = vpop.f32.mrf.mxu0  ;;  %v437_v33 = vpop.f32.mrf.mxu1 }
 0x130   :  { %v363_v32 = vadd.f32 %v362_v30, %v275_v6  ;;  %v2034_v35 = vadd.f32 %v437_v33, %v361_v29  ;;  %946 = vmatprep.mubr.f32.mxu0 %v597_v21  ;;  %v606_v6 = vld [vmem:[#allocation5 + $0x10] sm:$0xff] }
 0x131   :  { %v439_v37 = vpop.f32.mrf.mxu1  ;;  %947 = vmatmul.mubr.f32.vlgmr.msra.gmra.mxu0 %v596_v31  ;;  %v726_v33 = vld [vmem:[#allocation5 + $0x3d0] sm:$0xff] }
 0x132   :  { %v2038_v39 = vadd.f32 %v439_v37, %v363_v32  ;;  %1037 = vmatpush1.msra.mxu0 %v666_v34  ;;  %v600_v41 = vmax.f32 %v2034_v35, 0.0  ;;  %v723_v37 = vld [vmem:[#allocation5 + $0x3b8] sm:$0xff]  ;;  %v1243_v35 = vld [vmem:[#allocation7 + $0x168] sm:$0xff] }
 0x133   :  { %1038 = vmatprep.subr.mxu0 %v663_v36  ;;  %v794_v36 = vld [vmem:[#allocation5 + $0x5f0] sm:$0xff] }
 0x134   :  { %v601_v43 = vmax.f32 %v2038_v39, 0.0  ;;  %1039 = vmatpush1.msra.mxu0 %v662_v38  ;;  %v1250_v39 = vld [vmem:[#allocation7 + $0x1a0] sm:$0xff] }
 0x135   :  { %1040 = vmatprep.subr.mxu0 %v659_v40  ;;  %v791_v40 = vld [vmem:[#allocation5 + $0x5d8] sm:$0xff] }
 0x136   :  { %952 = vmatprep.mubr.f32.mxu0 %v601_v43  ;;  %1041 = vmatpush1.msra.mxu0 %v658_v42  ;;  %v722_v42 = vld [vmem:[#allocation5 + $0x3b0] sm:$0xff] }
 0x137   :  { %953 = vmatmul.mubr.f32.gmra.mxu0 %v600_v41  ;;  %1042 = vmatprep.subr.mxu0 %v655_v44 }
 0x138   :  { %1100 = vmatprep.mubr.f32.mxu0 %v597_v21  ;;  %1043 = vmatpush1.msra.mxu0 %v654_v45  ;;  %v790_v45 = vld [vmem:[#allocation5 + $0x5d0] sm:$0xff] }
 0x139   :  { %1044 = vmatprep.subr.mxu0 %v651_v46 }
 0x13a   :  { %1045 = vmatpush1.msra.mxu0 %v650_v47  ;;  %v787_v47 = vld [vmem:[#allocation5 + $0x5b8] sm:$0xff] }
 0x13b   :  { %1046 = vmatprep.subr.mxu0 %v647_v48  ;;  %v786_v48 = vld [vmem:[#allocation5 + $0x5b0] sm:$0xff] }
 0x13c   :  { %1047 = vmatpush1.msra.mxu0 %v646_v49  ;;  %v719_v49 = vld [vmem:[#allocation5 + $0x398] sm:$0xff] }
 0x13d   :  { %1048 = vmatprep.subr.mxu0 %v643_v50  ;;  %v783_v50 = vld [vmem:[#allocation5 + $0x598] sm:$0xff] }
 0x13e   :  { %1049 = vmatpush1.msra.mxu0 %v642_v51  ;;  %v718_v51 = vld [vmem:[#allocation5 + $0x390] sm:$0xff] }
 0x13f   :  { %1050 = vmatprep.subr.mxu0 %v639_v52  ;;  %v782_v52 = vld [vmem:[#allocation5 + $0x590] sm:$0xff] }
 0x140   :  { %1051 = vmatpush1.msra.mxu0 %v638_v53  ;;  %v715_v53 = vld [vmem:[#allocation5 + $0x378] sm:$0xff] }
 0x141   :  { %1052 = vmatprep.subr.mxu0 %v635_v54  ;;  %v779_v54 = vld [vmem:[#allocation5 + $0x578] sm:$0xff] }
 0x142   :  { %1053 = vmatpush1.msra.mxu0 %v634_v55  ;;  %v714_v55 = vld [vmem:[#allocation5 + $0x370] sm:$0xff] }
 0x143   :  { %1054 = vmatprep.subr.mxu0 %v631_v56  ;;  %v778_v56 = vld [vmem:[#allocation5 + $0x570] sm:$0xff] }
 0x144   :  { %1055 = vmatpush1.msra.mxu0 %v630_v57  ;;  %v711_v57 = vld [vmem:[#allocation5 + $0x358] sm:$0xff] }
 0x145   :  { %1056 = vmatprep.subr.mxu0 %v627_v58  ;;  %v775_v58 = vld [vmem:[#allocation5 + $0x558] sm:$0xff] }
 0x146   :  { %1057 = vmatpush1.msra.mxu0 %v626_v59  ;;  %v710_v59 = vld [vmem:[#allocation5 + $0x350] sm:$0xff] }
 0x147   :  { %1058 = vmatprep.subr.mxu0 %v623_v61  ;;  %v774_v61 = vld [vmem:[#allocation5 + $0x550] sm:$0xff] }
 0x148   :  { %1059 = vmatpush1.msra.mxu0 %v622_v62  ;;  %v707_v62 = vld [vmem:[#allocation5 + $0x338] sm:$0xff] }
 0x149   :  { %1060 = vmatprep.subr.mxu0 %v619_v1  ;;  %v771_v1 = vld [vmem:[#allocation5 + $0x538] sm:$0xff] }
 0x14a   :  { %1061 = vmatpush1.msra.mxu0 %v618_v5  ;;  %v770_v5 = vld [vmem:[#allocation5 + $0x530] sm:$0xff] }
 0x14b   :  { %v508_v10 = vpop.f32.mrf.mxu1  ;;  %v585_v14 = vpop.f32.mrf.mxu0  ;;  %1062 = vmatprep.subr.mxu0 %v615_v7  ;;  %v703_v7 = vld [vmem:[#allocation5 + $0x318] sm:$0xff] }
 0x14c   :  { %v509_v12 = vadd.f32 %v508_v10, %v279_v2  ;;  %1063 = vmatpush1.msra.mxu0 %v614_v9  ;;  %v702_v9 = vld [vmem:[#allocation5 + $0x310] sm:$0xff] }
 0x14d   :  { %v510_v17 = vpop.f32.mrf.mxu1  ;;  %v587_v23 = vpop.f32.mrf.mxu0  ;;  %1064 = vmatprep.subr.mxu0 %v611_v11  ;;  %v766_v10 = vld [vmem:[#allocation5 + $0x510] sm:$0xff]  ;;  %v699_v11 = vld [vmem:[#allocation5 + $0x2f8] sm:$0xff] }
 0x14e   :  { %v511_v19 = vadd.f32 %v510_v17, %v283_v8  ;;  %v2056_v24 = vadd.f32 %v585_v14, %v509_v12  ;;  %1065 = vmatpush1.msra.mxu0 %v610_v15  ;;  %v763_v12 = vld [vmem:[#allocation5 + $0x4f8] sm:$0xff]  ;;  %v698_v14 = vld [vmem:[#allocation5 + $0x2f0] sm:$0xff] }
 0x14f   :  { %v514_v3 = vpop.f32.mrf.mxu1  ;;  %1066 = vmatprep.subr.mxu0 %v607_v18  ;;  %v762_v15 = vld [vmem:[#allocation5 + $0x4f0] sm:$0xff]  ;;  %v695_v17 = vld [vmem:[#allocation5 + $0x2d8] sm:$0xff] }
 0x150   :  { %v588_v13 = vadd.f32 %v587_v23, %v511_v19  ;;  %v515_v0 = vadd.f32 %v514_v3, %v279_v2  ;;  %v591_v25 = vpop.f32.mrf.mxu0  ;;  %1067 = vmatpush1.msra.mxu0 %v606_v6  ;;  %v598_v34 = vmax.f32 %v2056_v24, 0.0  ;;  %v706_v2 = vld [vmem:[#allocation5 + $0x330] sm:$0xff]  ;;  %v759_v18 = vld [vmem:[#allocation5 + $0x4d8] sm:$0xff]  ;;  %v1311_v24 = vld [vmem:[#allocation7 + $0x388] sm:$0xff] }
 0x151   :  { %v516_v16 = vpop.f32.mrf.mxu1  ;;  %1068 = vmatprep.subr.mxu0 %v731_v22  ;;  %v694_v19 = vld [vmem:[#allocation5 + $0x2d0] sm:$0xff]  ;;  %v691_v6 = vld [vmem:[#allocation5 + $0x2b8] sm:$0xff] }
 0x152   :  { %v599_v29 = vmax.f32 %v588_v13, 0.0  ;;  %v517_v21 = vadd.f32 %v516_v16, %v283_v8  ;;  %v2058_v30 = vadd.f32 %v591_v25, %v515_v0  ;;  %v593_v32 = vpop.f32.mrf.mxu0  ;;  %1069 = vmatpush2.msra.mxu0 %v730_v26  ;;  %v767_v8 = vld [vmem:[#allocation5 + $0x518] sm:$0xff]  ;;  %v758_v23 = vld [vmem:[#allocation5 + $0x4d0] sm:$0xff] }
 0x153   :  { %1070 = vmatprep.subr.mxu0 %v727_v28  ;;  %v755_v3 = vld [vmem:[#allocation5 + $0x4b8] sm:$0xff]  ;;  %v690_v22 = vld [vmem:[#allocation5 + $0x2b0] sm:$0xff] }
 0x154   :  { %v2061_v38 = vadd.f32 %v593_v32, %v517_v21  ;;  %1023 = vmatprep.mubr.f32.mxu1 %v599_v29  ;;  %v602_v44 = vmax.f32 %v2058_v30, 0.0  ;;  %1071 = vmatpush2.msra.mxu0 %v726_v33  ;;  %v754_v13 = vld [vmem:[#allocation5 + $0x4b0] sm:$0xff]  ;;  %v687_v0 = vld [vmem:[#allocation5 + $0x298] sm:$0xff]  ;;  %v1382_v30 = vld [vmem:[#allocation7 + $0x5c0] sm:$0xff] }
 0x155   :  { %1024 = vmatmul.mubr.f32.vlgmr.msra.gmra.mxu1 %v598_v34  ;;  %1072 = vmatprep.subr.mxu0 %v723_v37  ;;  %v751_v25 = vld [vmem:[#allocation5 + $0x498] sm:$0xff]  ;;  %v686_v26 = vld [vmem:[#allocation5 + $0x290] sm:$0xff] }
 0x156   :  { %v603_v46 = vmax.f32 %v2061_v38, 0.0  ;;  %1114 = vmatpush1.msra.mxu1 %v794_v36  ;;  %1073 = vmatpush2.msra.mxu0 %v722_v42  ;;  %v750_v16 = vld [vmem:[#allocation5 + $0x490] sm:$0xff]  ;;  %v683_v28 = vld [vmem:[#allocation5 + $0x278] sm:$0xff]  ;;  %v1386_v38 = vld [vmem:[#allocation7 + $0x5e0] sm:$0xff] }
 0x157   :  { %1115 = vmatprep.subr.mxu1 %v791_v40  ;;  %1074 = vmatprep.subr.mxu0 %v719_v49  ;;  %v682_v21 = vld [vmem:[#allocation5 + $0x270] sm:$0xff]  ;;  %v679_v33 = vld [vmem:[#allocation5 + $0x258] sm:$0xff] }
 0x158   :  { %1116 = vmatpush1.msra.mxu1 %v790_v45  ;;  %1029 = vmatprep.mubr.f32.mxu1 %v603_v46  ;;  %v746_v32 = vld [vmem:[#allocation5 + $0x470] sm:$0xff]  ;;  %v743_v36 = vld [vmem:[#allocation5 + $0x458] sm:$0xff] }
 0x159   :  { %1117 = vmatprep.subr.mxu1 %v787_v47  ;;  %1030 = vmatmul.mubr.f32.gmra.mxu1 %v602_v44  ;;  %v678_v37 = vld [vmem:[#allocation5 + $0x250] sm:$0xff]  ;;  %v675_v42 = vld [vmem:[#allocation5 + $0x238] sm:$0xff] }
 0x15a   :  { %1118 = vmatpush1.msra.mxu1 %v786_v48  ;;  %1177 = vmatprep.mubr.f32.mxu1 %v599_v29  ;;  %v747_v29 = vld [vmem:[#allocation5 + $0x478] sm:$0xff]  ;;  %v742_v40 = vld [vmem:[#allocation5 + $0x450] sm:$0xff] }
 0x15b   :  { %1119 = vmatprep.subr.mxu1 %v783_v50  ;;  %1075 = vmatpush2.msra.mxu0 %v718_v51  ;;  %v739_v45 = vld [vmem:[#allocation5 + $0x438] sm:$0xff]  ;;  %v674_v47 = vld [vmem:[#allocation5 + $0x230] sm:$0xff] }
 0x15c   :  { %1120 = vmatpush1.msra.mxu1 %v782_v52  ;;  %1076 = vmatprep.subr.mxu0 %v715_v53  ;;  %v738_v48 = vld [vmem:[#allocation5 + $0x430] sm:$0xff]  ;;  %v671_v49 = vld [vmem:[#allocation5 + $0x218] sm:$0xff] }
 0x15d   :  { %1121 = vmatprep.subr.mxu1 %v779_v54  ;;  %1077 = vmatpush2.msra.mxu0 %v714_v55  ;;  %v735_v50 = vld [vmem:[#allocation5 + $0x418] sm:$0xff]  ;;  %v670_v51 = vld [vmem:[#allocation5 + $0x210] sm:$0xff] }
 0x15e   :  { %1122 = vmatpush1.msra.mxu1 %v778_v56  ;;  %1078 = vmatprep.subr.mxu0 %v711_v57  ;;  %v734_v52 = vld [vmem:[#allocation5 + $0x410] sm:$0xff]  ;;  %v859_v53 = vld [vmem:[#allocation5 + $0x7f8] sm:$0xff]  ;;  %v1259_v56 = vld [vmem:[#allocation7 + $0x1e8] sm:$0xff] }
 0x15f   :  { %1123 = vmatprep.subr.mxu1 %v775_v58  ;;  %1079 = vmatpush2.msra.mxu0 %v710_v59  ;;  %v858_v54 = vld [vmem:[#allocation5 + $0x7f0] sm:$0xff]  ;;  %v855_v55 = vld [vmem:[#allocation5 + $0x7d8] sm:$0xff]  ;;  %v1258_v58 = vld [vmem:[#allocation7 + $0x1e0] sm:$0xff] }
 0x160   :  { %1124 = vmatpush1.msra.mxu1 %v774_v61  ;;  %1080 = vmatprep.subr.mxu0 %v707_v62  ;;  %v854_v57 = vld [vmem:[#allocation5 + $0x7d0] sm:$0xff]  ;;  %v851_v59 = vld [vmem:[#allocation5 + $0x7b8] sm:$0xff]  ;;  %v1255_v62 = vld [vmem:[#allocation7 + $0x1c8] sm:$0xff] }
 0x161   :  { %1125 = vmatprep.subr.mxu1 %v771_v1  ;;  %1081 = vmatpush2.msra.mxu0 %v706_v2  ;;  %v850_v61 = vld [vmem:[#allocation5 + $0x7b0] sm:$0xff]  ;;  %v847_v1 = vld [vmem:[#allocation5 + $0x798] sm:$0xff]  ;;  %v1254_v2 = vld [vmem:[#allocation7 + $0x1c0] sm:$0xff] }
 0x162   :  { %1126 = vmatpush1.msra.mxu1 %v770_v5  ;;  %1082 = vmatprep.subr.mxu0 %v703_v7  ;;  %v843_v5 = vld [vmem:[#allocation5 + $0x778] sm:$0xff]  ;;  %v1247_v7 = vld [vmem:[#allocation7 + $0x188] sm:$0xff] }
 0x163   :  { %1127 = vmatprep.subr.mxu1 %v767_v8  ;;  %1083 = vmatpush2.msra.mxu0 %v702_v9  ;;  %v839_v8 = vld [vmem:[#allocation5 + $0x758] sm:$0xff]  ;;  %v1246_v9 = vld [vmem:[#allocation7 + $0x180] sm:$0xff] }
 0x164   :  { %1128 = vmatpush1.msra.mxu1 %v766_v10  ;;  %1084 = vmatprep.subr.mxu0 %v699_v11  ;;  %v838_v10 = vld [vmem:[#allocation5 + $0x750] sm:$0xff]  ;;  %v1242_v11 = vld [vmem:[#allocation7 + $0x160] sm:$0xff] }
 0x165   :  { %1129 = vmatprep.subr.mxu1 %v763_v12  ;;  %1085 = vmatpush2.msra.mxu0 %v698_v14  ;;  %v834_v12 = vld [vmem:[#allocation5 + $0x730] sm:$0xff]  ;;  %v1239_v14 = vld [vmem:[#allocation7 + $0x148] sm:$0xff] }
 0x166   :  { %1130 = vmatpush1.msra.mxu1 %v762_v15  ;;  %1086 = vmatprep.subr.mxu0 %v695_v17  ;;  %v831_v15 = vld [vmem:[#allocation5 + $0x718] sm:$0xff]  ;;  %v1238_v17 = vld [vmem:[#allocation7 + $0x140] sm:$0xff] }
 0x167   :  { %1131 = vmatprep.subr.mxu1 %v759_v18  ;;  %1087 = vmatpush2.msra.mxu0 %v694_v19  ;;  %v830_v18 = vld [vmem:[#allocation5 + $0x710] sm:$0xff]  ;;  %v1235_v19 = vld [vmem:[#allocation7 + $0x128] sm:$0xff] }
 0x168   :  { %1132 = vmatpush1.msra.mxu1 %v758_v23  ;;  %1088 = vmatprep.subr.mxu0 %v691_v6  ;;  %v827_v23 = vld [vmem:[#allocation5 + $0x6f8] sm:$0xff]  ;;  %v1234_v6 = vld [vmem:[#allocation7 + $0x120] sm:$0xff] }
 0x169   :  { %1133 = vmatprep.subr.mxu1 %v755_v3  ;;  %1089 = vmatpush2.msra.mxu0 %v690_v22  ;;  %v826_v3 = vld [vmem:[#allocation5 + $0x6f0] sm:$0xff]  ;;  %v1231_v22 = vld [vmem:[#allocation7 + $0x108] sm:$0xff] }
 0x16a   :  { %1134 = vmatpush1.msra.mxu1 %v754_v13  ;;  %1090 = vmatprep.subr.mxu0 %v687_v0  ;;  %v823_v13 = vld [vmem:[#allocation5 + $0x6d8] sm:$0xff]  ;;  %v1230_v0 = vld [vmem:[#allocation7 + $0x100] sm:$0xff] }
 0x16b   :  { %1135 = vmatprep.subr.mxu1 %v751_v25  ;;  %1091 = vmatpush2.msra.mxu0 %v686_v26  ;;  %v822_v25 = vld [vmem:[#allocation5 + $0x6d0] sm:$0xff]  ;;  %v1227_v26 = vld [vmem:[#allocation7 + $0xe8] sm:$0xff] }
 0x16c   :  { %1136 = vmatpush1.msra.mxu1 %v750_v16  ;;  %1092 = vmatprep.subr.mxu0 %v683_v28  ;;  %v819_v16 = vld [vmem:[#allocation5 + $0x6b8] sm:$0xff]  ;;  %v1226_v28 = vld [vmem:[#allocation7 + $0xe0] sm:$0xff] }
 0x16d   :  { %1137 = vmatprep.subr.mxu1 %v747_v29  ;;  %1093 = vmatpush2.msra.mxu0 %v682_v21  ;;  %v818_v29 = vld [vmem:[#allocation5 + $0x6b0] sm:$0xff]  ;;  %v1223_v21 = vld [vmem:[#allocation7 + $0xc8] sm:$0xff] }
 0x16e   :  { %1138 = vmatpush1.msra.mxu1 %v746_v32  ;;  %1094 = vmatprep.subr.mxu0 %v679_v33  ;;  %v815_v32 = vld [vmem:[#allocation5 + $0x698] sm:$0xff]  ;;  %v1222_v33 = vld [vmem:[#allocation7 + $0xc0] sm:$0xff] }
 0x16f   :  { %1139 = vmatprep.subr.mxu1 %v743_v36  ;;  %1095 = vmatpush2.msra.mxu0 %v678_v37  ;;  %v814_v36 = vld [vmem:[#allocation5 + $0x690] sm:$0xff]  ;;  %v1219_v37 = vld [vmem:[#allocation7 + $0xa8] sm:$0xff] }
 0x170   :  { %1140 = vmatpush1.msra.mxu1 %v742_v40  ;;  %1096 = vmatprep.subr.mxu0 %v675_v42  ;;  %v811_v40 = vld [vmem:[#allocation5 + $0x678] sm:$0xff]  ;;  %v1218_v42 = vld [vmem:[#allocation7 + $0xa0] sm:$0xff] }
 0x171   :  { %1141 = vmatprep.subr.mxu1 %v739_v45  ;;  %1097 = vmatpush2.msra.mxu0 %v674_v47  ;;  %v810_v45 = vld [vmem:[#allocation5 + $0x670] sm:$0xff]  ;;  %v1215_v47 = vld [vmem:[#allocation7 + $0x88] sm:$0xff] }
 0x172   :  { %1142 = vmatpush1.msra.mxu1 %v738_v48  ;;  %1098 = vmatprep.subr.mxu0 %v671_v49  ;;  %v807_v48 = vld [vmem:[#allocation5 + $0x658] sm:$0xff]  ;;  %v1214_v49 = vld [vmem:[#allocation7 + $0x80] sm:$0xff] }
 0x173   :  { %1143 = vmatprep.subr.mxu1 %v735_v50  ;;  %1099 = vmatpush2.msra.mxu0 %v670_v51  ;;  %v806_v50 = vld [vmem:[#allocation5 + $0x650] sm:$0xff]  ;;  %v1211_v51 = vld [vmem:[#allocation7 + $0x68] sm:$0xff] }
 0x174   :  { %1144 = vmatpush1.msra.mxu1 %v734_v52  ;;  %1101 = vmatmul.mubr.f32.vlgmr.msra.gmra.mxu0 %v596_v31  ;;  %v1251_v31 = vld [vmem:[#allocation7 + $0x1a8] sm:$0xff]  ;;  %v803_v52 = vld [vmem:[#allocation5 + $0x638] sm:$0xff] }
 0x175   :  { %1145 = vmatprep.subr.mxu1 %v859_v53  ;;  %1106 = vmatprep.mubr.f32.mxu0 %v601_v43  ;;  %v842_v43 = vld [vmem:[#allocation5 + $0x770] sm:$0xff]  ;;  %v1210_v53 = vld [vmem:[#allocation7 + $0x60] sm:$0xff] }
 0x176   :  { %1146 = vmatpush2.msra.mxu1 %v858_v54  ;;  %1476 = vmatprep.subr.mxu0 %v1259_v56  ;;  %v802_v54 = vld [vmem:[#allocation5 + $0x630] sm:$0xff]  ;;  %v799_v56 = vld [vmem:[#allocation5 + $0x618] sm:$0xff] }
 0x177   :  { %1147 = vmatprep.subr.mxu1 %v855_v55  ;;  %1477 = vmatpush1.msra.mxu0 %v1258_v58  ;;  %v1207_v55 = vld [vmem:[#allocation7 + $0x48] sm:$0xff]  ;;  %v798_v58 = vld [vmem:[#allocation5 + $0x610] sm:$0xff] }
 0x178   :  { %1148 = vmatpush2.msra.mxu1 %v854_v57  ;;  %1107 = vmatmul.mubr.f32.gmra.mxu0 %v600_v41  ;;  %v835_v41 = vld [vmem:[#allocation5 + $0x738] sm:$0xff]  ;;  %v1206_v57 = vld [vmem:[#allocation7 + $0x40] sm:$0xff] }
 0x179   :  { %1149 = vmatprep.subr.mxu1 %v851_v59  ;;  %1478 = vmatprep.subr.mxu0 %v1255_v62  ;;  %v1203_v59 = vld [vmem:[#allocation7 + $0x28] sm:$0xff] }
 0x17a   :  { %1150 = vmatpush2.msra.mxu1 %v850_v61  ;;  %1479 = vmatpush1.msra.mxu0 %v1254_v2  ;;  %v1202_v61 = vld [vmem:[#allocation7 + $0x20] sm:$0xff]  ;;  %v1199_v62 = vld [vmem:[#allocation7 + $0x8] sm:$0xff] }
 0x17b   :  { %1151 = vmatprep.subr.mxu1 %v847_v1  ;;  %1480 = vmatprep.subr.mxu0 %v1251_v31  ;;  %v1198_v1 = vld [vmem:[#allocation7] sm:$0xff]  ;;  %v1323_v2 = vld [vmem:[#allocation7 + $0x3e8] sm:$0xff] }
 0x17c   :  { %1152 = vmatpush2.msra.mxu1 %v846_v27  ;;  %1481 = vmatpush1.msra.mxu0 %v1250_v39  ;;  %v1322_v27 = vld [vmem:[#allocation7 + $0x3e0] sm:$0xff]  ;;  %v1319_v31 = vld [vmem:[#allocation7 + $0x3c8] sm:$0xff] }
 0x17d   :  { %1153 = vmatprep.subr.mxu1 %v843_v5  ;;  %1482 = vmatprep.subr.mxu0 %v1247_v7  ;;  %v1318_v5 = vld [vmem:[#allocation7 + $0x3c0] sm:$0xff]  ;;  %v1315_v39 = vld [vmem:[#allocation7 + $0x3a8] sm:$0xff] }
 0x17e   :  { %1154 = vmatpush2.msra.mxu1 %v842_v43  ;;  %1483 = vmatpush1.msra.mxu0 %v1246_v9  ;;  %v1314_v43 = vld [vmem:[#allocation7 + $0x3a0] sm:$0xff] }
 0x17f   :  { %1155 = vmatprep.subr.mxu1 %v839_v8  ;;  %1484 = vmatprep.subr.mxu0 %v1243_v35  ;;  %v1310_v7 = vld [vmem:[#allocation7 + $0x380] sm:$0xff]  ;;  %v1383_v8 = vld [vmem:[#allocation7 + $0x5c8] sm:$0xff] }
 0x180   :  { %1156 = vmatpush2.msra.mxu1 %v838_v10  ;;  %1485 = vmatpush1.msra.mxu0 %v1242_v11  ;;  %v1306_v9 = vld [vmem:[#allocation7 + $0x360] sm:$0xff]  ;;  %v1379_v10 = vld [vmem:[#allocation7 + $0x5a8] sm:$0xff] }
 0x181   :  { %1157 = vmatprep.subr.mxu1 %v835_v41  ;;  %1486 = vmatprep.subr.mxu0 %v1239_v14  ;;  %v1302_v35 = vld [vmem:[#allocation7 + $0x340] sm:$0xff]  ;;  %v1299_v11 = vld [vmem:[#allocation7 + $0x328] sm:$0xff] }
 0x182   :  { %1158 = vmatpush2.msra.mxu1 %v834_v12  ;;  %1487 = vmatpush1.msra.mxu0 %v1238_v17  ;;  %v1378_v41 = vld [vmem:[#allocation7 + $0x5a0] sm:$0xff]  ;;  %v1375_v12 = vld [vmem:[#allocation7 + $0x588] sm:$0xff] }
 0x183   :  { %1159 = vmatprep.subr.mxu1 %v831_v15  ;;  %1488 = vmatprep.subr.mxu0 %v1235_v19  ;;  %v1298_v14 = vld [vmem:[#allocation7 + $0x320] sm:$0xff]  ;;  %v1295_v17 = vld [vmem:[#allocation7 + $0x308] sm:$0xff] }
 0x184   :  { %1160 = vmatpush2.msra.mxu1 %v830_v18  ;;  %1489 = vmatpush1.msra.mxu0 %v1234_v6  ;;  %v1374_v15 = vld [vmem:[#allocation7 + $0x580] sm:$0xff]  ;;  %v1371_v18 = vld [vmem:[#allocation7 + $0x568] sm:$0xff] }
 0x185   :  { %1161 = vmatprep.subr.mxu1 %v827_v23  ;;  %1490 = vmatprep.subr.mxu0 %v1231_v22  ;;  %v1294_v19 = vld [vmem:[#allocation7 + $0x300] sm:$0xff]  ;;  %v1291_v6 = vld [vmem:[#allocation7 + $0x2e8] sm:$0xff] }
 0x186   :  { %1162 = vmatpush2.msra.mxu1 %v826_v3  ;;  %1491 = vmatpush1.msra.mxu0 %v1230_v0  ;;  %v1370_v23 = vld [vmem:[#allocation7 + $0x560] sm:$0xff]  ;;  %v1367_v3 = vld [vmem:[#allocation7 + $0x548] sm:$0xff] }
 0x187   :  { %1163 = vmatprep.subr.mxu1 %v823_v13  ;;  %1492 = vmatprep.subr.mxu0 %v1227_v26  ;;  %v1290_v22 = vld [vmem:[#allocation7 + $0x2e0] sm:$0xff]  ;;  %v1287_v0 = vld [vmem:[#allocation7 + $0x2c8] sm:$0xff] }
 0x188   :  { %1164 = vmatpush2.msra.mxu1 %v822_v25  ;;  %1493 = vmatpush1.msra.mxu0 %v1226_v28  ;;  %v1366_v13 = vld [vmem:[#allocation7 + $0x540] sm:$0xff]  ;;  %v1363_v25 = vld [vmem:[#allocation7 + $0x528] sm:$0xff] }
 0x189   :  { %1165 = vmatprep.subr.mxu1 %v819_v16  ;;  %1494 = vmatprep.subr.mxu0 %v1223_v21  ;;  %v1286_v26 = vld [vmem:[#allocation7 + $0x2c0] sm:$0xff]  ;;  %v1283_v28 = vld [vmem:[#allocation7 + $0x2a8] sm:$0xff] }
 0x18a   :  { %1166 = vmatpush2.msra.mxu1 %v818_v29  ;;  %1495 = vmatpush1.msra.mxu0 %v1222_v33  ;;  %v1362_v16 = vld [vmem:[#allocation7 + $0x520] sm:$0xff]  ;;  %v1359_v29 = vld [vmem:[#allocation7 + $0x508] sm:$0xff] }
 0x18b   :  { %1167 = vmatprep.subr.mxu1 %v815_v32  ;;  %1496 = vmatprep.subr.mxu0 %v1219_v37  ;;  %v1282_v21 = vld [vmem:[#allocation7 + $0x2a0] sm:$0xff]  ;;  %v1279_v33 = vld [vmem:[#allocation7 + $0x288] sm:$0xff] }
 0x18c   :  { %1168 = vmatpush2.msra.mxu1 %v814_v36  ;;  %1497 = vmatpush1.msra.mxu0 %v1218_v42  ;;  %v1358_v32 = vld [vmem:[#allocation7 + $0x500] sm:$0xff]  ;;  %v1355_v36 = vld [vmem:[#allocation7 + $0x4e8] sm:$0xff] }
 0x18d   :  { %1169 = vmatprep.subr.mxu1 %v811_v40  ;;  %1498 = vmatprep.subr.mxu0 %v1215_v47  ;;  %v1278_v37 = vld [vmem:[#allocation7 + $0x280] sm:$0xff]  ;;  %v1275_v42 = vld [vmem:[#allocation7 + $0x268] sm:$0xff] }
 0x18e   :  { %1170 = vmatpush2.msra.mxu1 %v810_v45  ;;  %1499 = vmatpush1.msra.mxu0 %v1214_v49  ;;  %v1354_v40 = vld [vmem:[#allocation7 + $0x4e0] sm:$0xff]  ;;  %v1351_v45 = vld [vmem:[#allocation7 + $0x4c8] sm:$0xff] }
 0x18f   :  { %1171 = vmatprep.subr.mxu1 %v807_v48  ;;  %1500 = vmatprep.subr.mxu0 %v1211_v51  ;;  %v1274_v47 = vld [vmem:[#allocation7 + $0x260] sm:$0xff]  ;;  %v1271_v49 = vld [vmem:[#allocation7 + $0x248] sm:$0xff] }
 0x190   :  { %1172 = vmatpush2.msra.mxu1 %v806_v50  ;;  %1501 = vmatpush1.msra.mxu0 %v1210_v53  ;;  %v1350_v48 = vld [vmem:[#allocation7 + $0x4c0] sm:$0xff]  ;;  %v1347_v50 = vld [vmem:[#allocation7 + $0x4a8] sm:$0xff] }
 0x191   :  { %1173 = vmatprep.subr.mxu1 %v803_v52  ;;  %1502 = vmatprep.subr.mxu0 %v1207_v55  ;;  %v1270_v51 = vld [vmem:[#allocation7 + $0x240] sm:$0xff]  ;;  %v1267_v53 = vld [vmem:[#allocation7 + $0x228] sm:$0xff] }
 0x192   :  { %1174 = vmatpush2.msra.mxu1 %v802_v54  ;;  %1503 = vmatpush1.msra.mxu0 %v1206_v57  ;;  %v1346_v52 = vld [vmem:[#allocation7 + $0x4a0] sm:$0xff]  ;;  %v1343_v54 = vld [vmem:[#allocation7 + $0x488] sm:$0xff] }
 0x193   :  { %1175 = vmatprep.subr.mxu1 %v799_v56  ;;  %1504 = vmatprep.subr.mxu0 %v1203_v59  ;;  %v1266_v55 = vld [vmem:[#allocation7 + $0x220] sm:$0xff]  ;;  %v1263_v57 = vld [vmem:[#allocation7 + $0x208] sm:$0xff] }
 0x194   :  { %1176 = vmatpush2.msra.mxu1 %v798_v58  ;;  %1505 = vmatpush1.msra.mxu0 %v1202_v61  ;;  %v1342_v56 = vld [vmem:[#allocation7 + $0x480] sm:$0xff]  ;;  %v1339_v58 = vld [vmem:[#allocation7 + $0x468] sm:$0xff] }
 0x195   :  { %1178 = vmatmul.mubr.f32.vlgmr.msra.gmra.mxu1 %v598_v34  ;;  %1506 = vmatprep.subr.mxu0 %v1199_v62  ;;  %v1387_v34 = vld [vmem:[#allocation7 + $0x5e8] sm:$0xff]  ;;  %v1262_v59 = vld [vmem:[#allocation7 + $0x200] sm:$0xff]  ;;  %v1261_v62 = vld [vmem:[#allocation7 + $0x1f8] sm:$0xff] }
 0x196   :  { %1183 = vmatprep.mubr.f32.mxu1 %v603_v46  ;;  %1507 = vmatpush1.msra.mxu0 %v1198_v1  ;;  %v1307_v46 = vld [vmem:[#allocation7 + $0x368] sm:$0xff]  ;;  %v1338_v61 = vld [vmem:[#allocation7 + $0x460] sm:$0xff] }
 0x197   :  { %1508 = vmatprep.subr.mxu0 %v1323_v2  ;;  %1553 = vmatprep.subr.mxu1 %v1387_v34  ;;  %v1335_v1 = vld [vmem:[#allocation7 + $0x448] sm:$0xff]  ;;  %v1334_v2 = vld [vmem:[#allocation7 + $0x440] sm:$0xff] }
 0x198   :  { %1509 = vmatpush2.msra.mxu0 %v1322_v27  ;;  %1554 = vmatpush1.msra.mxu1 %v1386_v38  ;;  %v1331_v27 = vld [vmem:[#allocation7 + $0x428] sm:$0xff] }
 0x199   :  { %1184 = vmatmul.mubr.f32.gmra.mxu1 %v602_v44  ;;  %1510 = vmatprep.subr.mxu0 %v1319_v31  ;;  %v1303_v44 = vld [vmem:[#allocation7 + $0x348] sm:$0xff]  ;;  %v1330_v31 = vld [vmem:[#allocation7 + $0x420] sm:$0xff] }
 0x19a   :  { %1511 = vmatpush2.msra.mxu0 %v1318_v5  ;;  %1555 = vmatprep.subr.mxu1 %v1383_v8  ;;  %v1327_v5 = vld [vmem:[#allocation7 + $0x408] sm:$0xff] }
 0x19b   :  { %1512 = vmatprep.subr.mxu0 %v1315_v39  ;;  %1556 = vmatpush1.msra.mxu1 %v1382_v30  ;;  %v1326_v39 = vld [vmem:[#allocation7 + $0x400] sm:$0xff]  ;;  %v1447_v34 = vld [vmem:[#allocation7 + $0x7c8] sm:$0xff] }
 0x19c   :  { %1513 = vmatpush2.msra.mxu0 %v1314_v43  ;;  %1557 = vmatprep.subr.mxu1 %v1379_v10  ;;  %v1451_v43 = vld [vmem:[#allocation7 + $0x7e8] sm:$0xff] }
 0x19d   :  { %1514 = vmatprep.subr.mxu0 %v1311_v24  ;;  %1558 = vmatpush1.msra.mxu1 %v1378_v41  ;;  %v1450_v24 = vld [vmem:[#allocation7 + $0x7e0] sm:$0xff]  ;;  %v1443_v38 = vld [vmem:[#allocation7 + $0x7a8] sm:$0xff] }
 0x19e   :  { %1515 = vmatpush2.msra.mxu0 %v1310_v7  ;;  %1559 = vmatprep.subr.mxu1 %v1375_v12  ;;  %v1446_v7 = vld [vmem:[#allocation7 + $0x7c0] sm:$0xff]  ;;  %v1439_v8 = vld [vmem:[#allocation7 + $0x788] sm:$0xff] }
 0x19f   :  { %1516 = vmatprep.subr.mxu0 %v1307_v46  ;;  %1560 = vmatpush1.msra.mxu1 %v1374_v15  ;;  %v1442_v46 = vld [vmem:[#allocation7 + $0x7a0] sm:$0xff]  ;;  %v1435_v30 = vld [vmem:[#allocation7 + $0x768] sm:$0xff] }
 0x1a0   :  { %1517 = vmatpush2.msra.mxu0 %v1306_v9  ;;  %1561 = vmatprep.subr.mxu1 %v1371_v18  ;;  %v1438_v9 = vld [vmem:[#allocation7 + $0x780] sm:$0xff]  ;;  %v1431_v10 = vld [vmem:[#allocation7 + $0x748] sm:$0xff] }
 0x1a1   :  { %1518 = vmatprep.subr.mxu0 %v1303_v44  ;;  %1562 = vmatpush1.msra.mxu1 %v1370_v23  ;;  %v1434_v44 = vld [vmem:[#allocation7 + $0x760] sm:$0xff]  ;;  %v1427_v41 = vld [vmem:[#allocation7 + $0x728] sm:$0xff] }
 0x1a2   :  { %1519 = vmatpush2.msra.mxu0 %v1302_v35  ;;  %1563 = vmatprep.subr.mxu1 %v1367_v3  ;;  %v1430_v35 = vld [vmem:[#allocation7 + $0x740] sm:$0xff]  ;;  %v1423_v12 = vld [vmem:[#allocation7 + $0x708] sm:$0xff] }
 0x1a3   :  { %1520 = vmatprep.subr.mxu0 %v1299_v11  ;;  %1564 = vmatpush1.msra.mxu1 %v1366_v13  ;;  %v1426_v11 = vld [vmem:[#allocation7 + $0x720] sm:$0xff]  ;;  %v1419_v15 = vld [vmem:[#allocation7 + $0x6e8] sm:$0xff] }
 0x1a4   :  { %1521 = vmatpush2.msra.mxu0 %v1298_v14  ;;  %1565 = vmatprep.subr.mxu1 %v1363_v25  ;;  %v1422_v14 = vld [vmem:[#allocation7 + $0x700] sm:$0xff]  ;;  %v1415_v18 = vld [vmem:[#allocation7 + $0x6c8] sm:$0xff] }
 0x1a5   :  { %1522 = vmatprep.subr.mxu0 %v1295_v17  ;;  %1566 = vmatpush1.msra.mxu1 %v1362_v16  ;;  %v1418_v17 = vld [vmem:[#allocation7 + $0x6e0] sm:$0xff]  ;;  %v1411_v23 = vld [vmem:[#allocation7 + $0x6a8] sm:$0xff] }
 0x1a6   :  { %1523 = vmatpush2.msra.mxu0 %v1294_v19  ;;  %1567 = vmatprep.subr.mxu1 %v1359_v29  ;;  %v1414_v19 = vld [vmem:[#allocation7 + $0x6c0] sm:$0xff]  ;;  %v1407_v3 = vld [vmem:[#allocation7 + $0x688] sm:$0xff] }
 0x1a7   :  { %1524 = vmatprep.subr.mxu0 %v1291_v6  ;;  %1568 = vmatpush1.msra.mxu1 %v1358_v32  ;;  %v1410_v6 = vld [vmem:[#allocation7 + $0x6a0] sm:$0xff]  ;;  %v1403_v13 = vld [vmem:[#allocation7 + $0x668] sm:$0xff]  ;;  %v1389_v32 = vld [vmem:[#allocation7 + $0x5f8] sm:$0xff] }
 0x1a8   :  { %1525 = vmatpush2.msra.mxu0 %v1290_v22  ;;  %1569 = vmatprep.subr.mxu1 %v1355_v36  ;;  %v1406_v22 = vld [vmem:[#allocation7 + $0x680] sm:$0xff]  ;;  %v1399_v25 = vld [vmem:[#allocation7 + $0x648] sm:$0xff] }
 0x1a9   :  { %1526 = vmatprep.subr.mxu0 %v1287_v0  ;;  %1570 = vmatpush1.msra.mxu1 %v1354_v40  ;;  %v1402_v0 = vld [vmem:[#allocation7 + $0x660] sm:$0xff]  ;;  %v1395_v16 = vld [vmem:[#allocation7 + $0x628] sm:$0xff] }
 0x1aa   :  { %1527 = vmatpush2.msra.mxu0 %v1286_v26  ;;  %1571 = vmatprep.subr.mxu1 %v1351_v45  ;;  %v1398_v26 = vld [vmem:[#allocation7 + $0x640] sm:$0xff]  ;;  %v1391_v29 = vld [vmem:[#allocation7 + $0x608] sm:$0xff] }
 0x1ab   :  { %1528 = vmatprep.subr.mxu0 %v1283_v28  ;;  %1572 = vmatpush1.msra.mxu1 %v1350_v48  ;;  %v1394_v28 = vld [vmem:[#allocation7 + $0x620] sm:$0xff] }
 0x1ac   :  { %1529 = vmatpush2.msra.mxu0 %v1282_v21  ;;  %1573 = vmatprep.subr.mxu1 %v1347_v50  ;;  %v1390_v21 = vld [vmem:[#allocation7 + $0x600] sm:$0xff] }
 0x1ad   :  { %1530 = vmatprep.subr.mxu0 %v1279_v33  ;;  %1574 = vmatpush1.msra.mxu1 %v1346_v52  ;;  %v2086_v36 = vld [vmem:[%s2155_s4] sm:$0xf] }
 0x1ae   :  { %1531 = vmatpush2.msra.mxu0 %v1278_v37  ;;  %1575 = vmatprep.subr.mxu1 %v1343_v54  ;;  %v865_v37 = vrot.slane %v2086_v36, %v2017_v20 }
 0x1af   :  { %1532 = vmatprep.subr.mxu0 %v1275_v42  ;;  %1576 = vmatpush1.msra.mxu1 %v1342_v56  ;;  %v869_v42 = vrot.slane %v2086_v36, %v2025_v4 }
 0x1b0   :  { %1533 = vmatpush2.msra.mxu0 %v1274_v47  ;;  %1577 = vmatprep.subr.mxu1 %v1339_v58 }
 0x1b1   :  { %1534 = vmatprep.subr.mxu0 %v1271_v49  ;;  %1578 = vmatpush1.msra.mxu1 %v1338_v61 }
 0x1b2   :  { %1535 = vmatpush2.msra.mxu0 %v1270_v51  ;;  %1579 = vmatprep.subr.mxu1 %v1335_v1 }
 0x1b3   :  { %1536 = vmatprep.subr.mxu0 %v1267_v53  ;;  %1580 = vmatpush1.msra.mxu1 %v1334_v2  ;;  %v1257_v2 = vld [vmem:[#allocation7 + $0x1d8] sm:$0xff] }
 0x1b4   :  { %1537 = vmatpush2.msra.mxu0 %v1266_v55  ;;  %1581 = vmatprep.subr.mxu1 %v1331_v27  ;;  %v1256_v27 = vld [vmem:[#allocation7 + $0x1d0] sm:$0xff] }
 0x1b5   :  { %1538 = vmatprep.subr.mxu0 %v1263_v57  ;;  %1582 = vmatpush1.msra.mxu1 %v1330_v31 }
 0x1b6   :  { %1539 = vmatpush2.msra.mxu0 %v1262_v59  ;;  %1583 = vmatprep.subr.mxu1 %v1327_v5  ;;  %v1253_v5 = vld [vmem:[#allocation7 + $0x1b8] sm:$0xff] }
 0x1b7   :  { %1630 = vmatprep.subr.mxu0 %v1261_v62  ;;  %1584 = vmatpush1.msra.mxu1 %v1326_v39  ;;  %v1260_v62 = vld [vmem:[#allocation7 + $0x1f0] sm:$0xff] }
 0x1b8   :  { %1585 = vmatprep.subr.mxu1 %v1451_v43  ;;  %v1252_v43 = vld [vmem:[#allocation7 + $0x1b0] sm:$0xff] }
 0x1b9   :  { %1586 = vmatpush2.msra.mxu1 %v1450_v24  ;;  %v1249_v24 = vld [vmem:[#allocation7 + $0x198] sm:$0xff] }
 0x1ba   :  { %1587 = vmatprep.subr.mxu1 %v1447_v34  ;;  %v1248_v34 = vld [vmem:[#allocation7 + $0x190] sm:$0xff] }
 0x1bb   :  { %1588 = vmatpush2.msra.mxu1 %v1446_v7  ;;  %v1245_v7 = vld [vmem:[#allocation7 + $0x178] sm:$0xff] }
 0x1bc   :  { %1589 = vmatprep.subr.mxu1 %v1443_v38  ;;  %v1244_v38 = vld [vmem:[#allocation7 + $0x170] sm:$0xff] }
 0x1bd   :  { %1590 = vmatpush2.msra.mxu1 %v1442_v46  ;;  %v1241_v46 = vld [vmem:[#allocation7 + $0x158] sm:$0xff] }
 0x1be   :  { %1591 = vmatprep.subr.mxu1 %v1439_v8  ;;  %v1240_v8 = vld [vmem:[#allocation7 + $0x150] sm:$0xff] }
 0x1bf   :  { %1592 = vmatpush2.msra.mxu1 %v1438_v9  ;;  %v1237_v9 = vld [vmem:[#allocation7 + $0x138] sm:$0xff] }
 0x1c0   :  { %1593 = vmatprep.subr.mxu1 %v1435_v30  ;;  %v1236_v30 = vld [vmem:[#allocation7 + $0x130] sm:$0xff] }
 0x1c1   :  { %1594 = vmatpush2.msra.mxu1 %v1434_v44  ;;  %v1233_v44 = vld [vmem:[#allocation7 + $0x118] sm:$0xff] }
 0x1c2   :  { %1595 = vmatprep.subr.mxu1 %v1431_v10  ;;  %v1232_v10 = vld [vmem:[#allocation7 + $0x110] sm:$0xff] }
 0x1c3   :  { %1596 = vmatpush2.msra.mxu1 %v1430_v35  ;;  %v1229_v35 = vld [vmem:[#allocation7 + $0xf8] sm:$0xff] }
 0x1c4   :  { %1597 = vmatprep.subr.mxu1 %v1427_v41  ;;  %v1228_v41 = vld [vmem:[#allocation7 + $0xf0] sm:$0xff] }
 0x1c5   :  { %1598 = vmatpush2.msra.mxu1 %v1426_v11  ;;  %v1225_v11 = vld [vmem:[#allocation7 + $0xd8] sm:$0xff] }
 0x1c6   :  { %1599 = vmatprep.subr.mxu1 %v1423_v12  ;;  %v1224_v12 = vld [vmem:[#allocation7 + $0xd0] sm:$0xff] }
 0x1c7   :  { %1600 = vmatpush2.msra.mxu1 %v1422_v14  ;;  %v1221_v14 = vld [vmem:[#allocation7 + $0xb8] sm:$0xff] }
 0x1c8   :  { %1601 = vmatprep.subr.mxu1 %v1419_v15  ;;  %v1220_v15 = vld [vmem:[#allocation7 + $0xb0] sm:$0xff] }
 0x1c9   :  { %1602 = vmatpush2.msra.mxu1 %v1418_v17  ;;  %v1217_v17 = vld [vmem:[#allocation7 + $0x98] sm:$0xff] }
 0x1ca   :  { %1603 = vmatprep.subr.mxu1 %v1415_v18  ;;  %v1216_v18 = vld [vmem:[#allocation7 + $0x90] sm:$0xff] }
 0x1cb   :  { %1604 = vmatpush2.msra.mxu1 %v1414_v19  ;;  %v1213_v19 = vld [vmem:[#allocation7 + $0x78] sm:$0xff] }
 0x1cc   :  { %1605 = vmatprep.subr.mxu1 %v1411_v23  ;;  %v1212_v23 = vld [vmem:[#allocation7 + $0x70] sm:$0xff] }
 0x1cd   :  { %1606 = vmatpush2.msra.mxu1 %v1410_v6  ;;  %v1209_v6 = vld [vmem:[#allocation7 + $0x58] sm:$0xff] }
 0x1ce   :  { %1607 = vmatprep.subr.mxu1 %v1407_v3  ;;  %v1208_v3 = vld [vmem:[#allocation7 + $0x50] sm:$0xff] }
 0x1cf   :  { %1608 = vmatpush2.msra.mxu1 %v1406_v22  ;;  %v1205_v22 = vld [vmem:[#allocation7 + $0x38] sm:$0xff] }
 0x1d0   :  { %1609 = vmatprep.subr.mxu1 %v1403_v13  ;;  %v1204_v13 = vld [vmem:[#allocation7 + $0x30] sm:$0xff] }
 0x1d1   :  { %1610 = vmatpush2.msra.mxu1 %v1402_v0  ;;  %v1201_v0 = vld [vmem:[#allocation7 + $0x18] sm:$0xff] }
 0x1d2   :  { %1611 = vmatprep.subr.mxu1 %v1399_v25  ;;  %v1200_v25 = vld [vmem:[#allocation7 + $0x10] sm:$0xff] }
 0x1d3   :  { %1612 = vmatpush2.msra.mxu1 %v1398_v26  ;;  %v1325_v26 = vld [vmem:[#allocation7 + $0x3f8] sm:$0xff] }
 0x1d4   :  { %1613 = vmatprep.subr.mxu1 %v1395_v16  ;;  %v1324_v16 = vld [vmem:[#allocation7 + $0x3f0] sm:$0xff] }
 0x1d5   :  { %1614 = vmatpush2.msra.mxu1 %v1394_v28  ;;  %v1321_v28 = vld [vmem:[#allocation7 + $0x3d8] sm:$0xff] }
 0x1d6   :  { %1615 = vmatprep.subr.mxu1 %v1391_v29  ;;  %v1320_v29 = vld [vmem:[#allocation7 + $0x3d0] sm:$0xff] }
 0x1d7   :  { %1616 = vmatpush2.msra.mxu1 %v1390_v21  ;;  %v1317_v21 = vld [vmem:[#allocation7 + $0x3b8] sm:$0xff] }
 0x1d8   :  { %1707 = vmatprep.subr.mxu1 %v1389_v32  ;;  %v1316_v32 = vld [vmem:[#allocation7 + $0x3b0] sm:$0xff] }
 0x1f1   :  { %v948_v33 = vpop.f32.mrf.mxu0 }
 0x1f2   :  { %v949_v47 = vadd.f32 %v948_v33, %v865_v37  ;;  %v1313_v33 = vld [vmem:[#allocation7 + $0x398] sm:$0xff] }
 0x1f3   :  { %v950_v40 = vpop.f32.mrf.mxu0 }
 0x1f4   :  { %v951_v49 = vadd.f32 %v950_v40, %v869_v42  ;;  %v1309_v40 = vld [vmem:[#allocation7 + $0x378] sm:$0xff] }
 0x1f7   :  { %v954_v45 = vpop.f32.mrf.mxu0 }
 0x1f8   :  { %v955_v54 = vadd.f32 %v954_v45, %v865_v37  ;;  %v1312_v37 = vld [vmem:[#allocation7 + $0x390] sm:$0xff]  ;;  %v1305_v45 = vld [vmem:[#allocation7 + $0x358] sm:$0xff] }
 0x1f9   :  { %v956_v50 = vpop.f32.mrf.mxu0 }
 0x1fa   :  { %v957_v56 = vadd.f32 %v956_v50, %v869_v42  ;;  %v1308_v42 = vld [vmem:[#allocation7 + $0x370] sm:$0xff]  ;;  %v1297_v50 = vld [vmem:[#allocation7 + $0x318] sm:$0xff] }
 0x215   :  { %v1025_v48 = vpop.f32.mrf.mxu1 }
 0x216   :  { %v2092_v51 = vadd.f32 %v1025_v48, %v949_v47  ;;  %v1304_v47 = vld [vmem:[#allocation7 + $0x350] sm:$0xff]  ;;  %v1301_v48 = vld [vmem:[#allocation7 + $0x338] sm:$0xff] }
 0x217   :  { %v1027_v52 = vpop.f32.mrf.mxu1 }
 0x218   :  { %v1028_v53 = vadd.f32 %v1027_v52, %v951_v49  ;;  %v1190_v58 = vmax.f32 %v2092_v51, 0.0  ;;  %v1300_v49 = vld [vmem:[#allocation7 + $0x330] sm:$0xff] }
 0x219   :  { %v1031_v55 = vpop.f32.mrf.mxu1  ;;  %v1296_v52 = vld [vmem:[#allocation7 + $0x310] sm:$0xff] }
 0x21a   :  { %v1191_v57 = vmax.f32 %v1028_v53, 0.0  ;;  %v2095_v59 = vadd.f32 %v1031_v55, %v955_v54  ;;  %v1293_v53 = vld [vmem:[#allocation7 + $0x2f8] sm:$0xff]  ;;  %v1292_v55 = vld [vmem:[#allocation7 + $0x2f0] sm:$0xff] }
 0x21b   :  { %v1033_v61 = vpop.f32.mrf.mxu1  ;;  %v1376_v51 = vld [vmem:[#allocation7 + $0x590] sm:$0xff] }
 0x21c   :  { %v2097_v1 = vadd.f32 %v1033_v61, %v957_v56  ;;  %1540 = vmatprep.mubr.f32.mxu0 %v1191_v57  ;;  %v1194_v39 = vmax.f32 %v2095_v59, 0.0  ;;  %v1289_v56 = vld [vmem:[#allocation7 + $0x2d8] sm:$0xff] }
 0x21d   :  { %1541 = vmatmul.mubr.f32.vlgmr.msra.gmra.mxu0 %v1190_v58  ;;  %v1285_v61 = vld [vmem:[#allocation7 + $0x2b8] sm:$0xff] }
 0x21e   :  { %v1195_v31 = vmax.f32 %v2097_v1, 0.0  ;;  %1631 = vmatpush1.msra.mxu0 %v1260_v62  ;;  %v1372_v1 = vld [vmem:[#allocation7 + $0x570] sm:$0xff]  ;;  %v1357_v59 = vld [vmem:[#allocation7 + $0x4f8] sm:$0xff] }
 0x21f   :  { %1632 = vmatprep.subr.mxu0 %v1257_v2  ;;  %v1284_v2 = vld [vmem:[#allocation7 + $0x2b0] sm:$0xff] }
 0x220   :  { %1633 = vmatpush1.msra.mxu0 %v1256_v27  ;;  %1546 = vmatprep.mubr.f32.mxu0 %v1195_v31  ;;  %v1281_v27 = vld [vmem:[#allocation7 + $0x298] sm:$0xff] }
 0x221   :  { %1634 = vmatprep.subr.mxu0 %v1253_v5  ;;  %1547 = vmatmul.mubr.f32.gmra.mxu0 %v1194_v39  ;;  %v873_v5 = vrot.slane %v2086_v36, %v2047_v60 }
 0x222   :  { %1635 = vmatpush1.msra.mxu0 %v1252_v43  ;;  %1694 = vmatprep.mubr.f32.mxu0 %v1191_v57  ;;  %v1288_v57 = vld [vmem:[#allocation7 + $0x2d0] sm:$0xff] }
 0x223   :  { %1636 = vmatprep.subr.mxu0 %v1249_v24  ;;  %v1280_v43 = vld [vmem:[#allocation7 + $0x290] sm:$0xff]  ;;  %v877_v24 = vrot.slane %v2086_v36, %v2050_v63 }
 0x224   :  { %1637 = vmatpush1.msra.mxu0 %v1248_v34  ;;  %v1277_v34 = vld [vmem:[#allocation7 + $0x278] sm:$0xff]  ;;  %v1268_v36 = vld [vmem:[#allocation7 + $0x230] sm:$0xff] }
 0x225   :  { %1638 = vmatprep.subr.mxu0 %v1245_v7 }
 0x226   :  { %1639 = vmatpush1.msra.mxu0 %v1244_v38  ;;  %v1276_v38 = vld [vmem:[#allocation7 + $0x270] sm:$0xff] }
 0x227   :  { %1640 = vmatprep.subr.mxu0 %v1241_v46  ;;  %v1273_v46 = vld [vmem:[#allocation7 + $0x258] sm:$0xff] }
 0x228   :  { %1641 = vmatpush1.msra.mxu0 %v1240_v8 }
 0x229   :  { %1642 = vmatprep.subr.mxu0 %v1237_v9 }
 0x22a   :  { %1643 = vmatpush1.msra.mxu0 %v1236_v30  ;;  %v1272_v30 = vld [vmem:[#allocation7 + $0x250] sm:$0xff] }
 0x22b   :  { %1644 = vmatprep.subr.mxu0 %v1233_v44 }
 0x22c   :  { %1645 = vmatpush1.msra.mxu0 %v1232_v10  ;;  %v1269_v10 = vld [vmem:[#allocation7 + $0x238] sm:$0xff] }
 0x22d   :  { %1646 = vmatprep.subr.mxu0 %v1229_v35 }
 0x22e   :  { %1647 = vmatpush1.msra.mxu0 %v1228_v41 }
 0x22f   :  { %1648 = vmatprep.subr.mxu0 %v1225_v11 }
 0x230   :  { %1649 = vmatpush1.msra.mxu0 %v1224_v12 }
 0x231   :  { %1650 = vmatprep.subr.mxu0 %v1221_v14  ;;  %v1265_v14 = vld [vmem:[#allocation7 + $0x218] sm:$0xff] }
 0x232   :  { %1651 = vmatpush1.msra.mxu0 %v1220_v15 }
 0x233   :  { %1652 = vmatprep.subr.mxu0 %v1217_v17 }
 0x234   :  { %1653 = vmatpush1.msra.mxu0 %v1216_v18  ;;  %v1102_v54 = vpop.f32.mrf.mxu0  ;;  %v1264_v18 = vld [vmem:[#allocation7 + $0x210] sm:$0xff] }
 0x235   :  { %1654 = vmatprep.subr.mxu0 %v1213_v19  ;;  %v1103_v8 = vadd.f32 %v1102_v54, %v873_v5  ;;  %v1341_v54 = vld [vmem:[#allocation7 + $0x478] sm:$0xff] }
 0x236   :  { %1655 = vmatpush1.msra.mxu0 %v1212_v23  ;;  %v1104_v62 = vpop.f32.mrf.mxu0 }
 0x237   :  { %1656 = vmatprep.subr.mxu0 %v1209_v6  ;;  %v1105_v44 = vadd.f32 %v1104_v62, %v877_v24  ;;  %v1332_v62 = vld [vmem:[#allocation7 + $0x430] sm:$0xff] }
 0x238   :  { %1657 = vmatpush1.msra.mxu0 %v1208_v3  ;;  %v1108_v7 = vpop.f32.mrf.mxu0 }
 0x239   :  { %1658 = vmatprep.subr.mxu0 %v1205_v22  ;;  %v1109_v15 = vadd.f32 %v1108_v7, %v873_v5  ;;  %v1453_v5 = vld [vmem:[#allocation7 + $0x7f8] sm:$0xff] }
 0x23a   :  { %1659 = vmatpush1.msra.mxu0 %v1204_v13  ;;  %v1110_v35 = vpop.f32.mrf.mxu0  ;;  %v1388_v13 = vld [vmem:[#allocation7 + $0x5f0] sm:$0xff]  ;;  %v1445_v7 = vld [vmem:[#allocation7 + $0x7b8] sm:$0xff] }
 0x23b   :  { %1660 = vmatprep.subr.mxu0 %v1201_v0  ;;  %v1111_v19 = vadd.f32 %v1110_v35, %v877_v24  ;;  %v1449_v24 = vld [vmem:[#allocation7 + $0x7d8] sm:$0xff] }
 0x23c   :  { %1661 = vmatpush1.msra.mxu0 %v1200_v25  ;;  %v1385_v25 = vld [vmem:[#allocation7 + $0x5d8] sm:$0xff] }
 0x23d   :  { %1662 = vmatprep.subr.mxu0 %v1325_v26  ;;  %v1384_v26 = vld [vmem:[#allocation7 + $0x5d0] sm:$0xff]  ;;  %v1429_v35 = vld [vmem:[#allocation7 + $0x738] sm:$0xff] }
 0x23e   :  { %1663 = vmatpush2.msra.mxu0 %v1324_v16 }
 0x23f   :  { %1664 = vmatprep.subr.mxu0 %v1321_v28  ;;  %v1381_v28 = vld [vmem:[#allocation7 + $0x5b8] sm:$0xff] }
 0x240   :  { %1665 = vmatpush2.msra.mxu0 %v1320_v29 }
 0x241   :  { %1666 = vmatprep.subr.mxu0 %v1317_v21  ;;  %v1380_v21 = vld [vmem:[#allocation7 + $0x5b0] sm:$0xff] }
 0x242   :  { %1667 = vmatpush2.msra.mxu0 %v1316_v32  ;;  %v1377_v32 = vld [vmem:[#allocation7 + $0x598] sm:$0xff] }
 0x243   :  { %1668 = vmatprep.subr.mxu0 %v1313_v33  ;;  %v1368_v33 = vld [vmem:[#allocation7 + $0x550] sm:$0xff] }
 0x244   :  { %1669 = vmatpush2.msra.mxu0 %v1312_v37  ;;  %v1365_v37 = vld [vmem:[#allocation7 + $0x538] sm:$0xff] }
 0x245   :  { %1670 = vmatprep.subr.mxu0 %v1309_v40  ;;  %v1364_v40 = vld [vmem:[#allocation7 + $0x530] sm:$0xff] }
 0x246   :  { %1671 = vmatpush2.msra.mxu0 %v1308_v42  ;;  %v1361_v42 = vld [vmem:[#allocation7 + $0x518] sm:$0xff] }
 0x247   :  { %1672 = vmatprep.subr.mxu0 %v1305_v45  ;;  %v1360_v45 = vld [vmem:[#allocation7 + $0x510] sm:$0xff] }
 0x248   :  { %1673 = vmatpush2.msra.mxu0 %v1304_v47  ;;  %v1353_v47 = vld [vmem:[#allocation7 + $0x4d8] sm:$0xff] }
 0x249   :  { %1674 = vmatprep.subr.mxu0 %v1301_v48  ;;  %v1352_v48 = vld [vmem:[#allocation7 + $0x4d0] sm:$0xff] }
 0x24a   :  { %1675 = vmatpush2.msra.mxu0 %v1300_v49  ;;  %v1349_v49 = vld [vmem:[#allocation7 + $0x4b8] sm:$0xff] }
 0x24b   :  { %1676 = vmatprep.subr.mxu0 %v1297_v50  ;;  %v1348_v50 = vld [vmem:[#allocation7 + $0x4b0] sm:$0xff] }
 0x24c   :  { %1677 = vmatpush2.msra.mxu0 %v1296_v52  ;;  %v1345_v52 = vld [vmem:[#allocation7 + $0x498] sm:$0xff] }
 0x24d   :  { %1678 = vmatprep.subr.mxu0 %v1293_v53  ;;  %v1344_v53 = vld [vmem:[#allocation7 + $0x490] sm:$0xff] }
 0x24e   :  { %1679 = vmatpush2.msra.mxu0 %v1292_v55  ;;  %v1340_v55 = vld [vmem:[#allocation7 + $0x470] sm:$0xff] }
 0x24f   :  { %1680 = vmatprep.subr.mxu0 %v1289_v56  ;;  %v1337_v56 = vld [vmem:[#allocation7 + $0x458] sm:$0xff] }
 0x250   :  { %1681 = vmatpush2.msra.mxu0 %v1288_v57  ;;  %v1336_v57 = vld [vmem:[#allocation7 + $0x450] sm:$0xff] }
 0x251   :  { %1682 = vmatprep.subr.mxu0 %v1285_v61  ;;  %v1333_v61 = vld [vmem:[#allocation7 + $0x438] sm:$0xff] }
 0x252   :  { %1683 = vmatpush2.msra.mxu0 %v1284_v2  ;;  %v1329_v2 = vld [vmem:[#allocation7 + $0x418] sm:$0xff] }
 0x253   :  { %1684 = vmatprep.subr.mxu0 %v1281_v27  ;;  %v1328_v27 = vld [vmem:[#allocation7 + $0x410] sm:$0xff] }
 0x254   :  { %1685 = vmatpush2.msra.mxu0 %v1280_v43  ;;  %v1452_v43 = vld [vmem:[#allocation7 + $0x7f0] sm:$0xff] }
 0x255   :  { %v1179_v9 = vpop.f32.mrf.mxu1  ;;  %1686 = vmatprep.subr.mxu0 %v1277_v34  ;;  %v1448_v34 = vld [vmem:[#allocation7 + $0x7d0] sm:$0xff] }
 0x256   :  { %1687 = vmatpush2.msra.mxu0 %v1276_v38  ;;  %v2111_v41 = vadd.f32 %v1179_v9, %v1103_v8  ;;  %v1444_v38 = vld [vmem:[#allocation7 + $0x7b0] sm:$0xff]  ;;  %v1437_v9 = vld [vmem:[#allocation7 + $0x778] sm:$0xff] }
 0x257   :  { %v1181_v11 = vpop.f32.mrf.mxu1  ;;  %1688 = vmatprep.subr.mxu0 %v1273_v46  ;;  %v1441_v46 = vld [vmem:[#allocation7 + $0x798] sm:$0xff]  ;;  %v1440_v8 = vld [vmem:[#allocation7 + $0x790] sm:$0xff] }
 0x258   :  { %v1182_v12 = vadd.f32 %v1181_v11, %v1105_v44  ;;  %1689 = vmatpush2.msra.mxu0 %v1272_v30  ;;  %v1192_v6 = vmax.f32 %v2111_v41, 0.0  ;;  %v1436_v30 = vld [vmem:[#allocation7 + $0x770] sm:$0xff]  ;;  %v1433_v44 = vld [vmem:[#allocation7 + $0x758] sm:$0xff] }
 0x259   :  { %v1185_v17 = vpop.f32.mrf.mxu1  ;;  %1690 = vmatprep.subr.mxu0 %v1269_v10  ;;  %v1432_v10 = vld [vmem:[#allocation7 + $0x750] sm:$0xff] }
 0x25a   :  { %v1193_v23 = vmax.f32 %v1182_v12, 0.0  ;;  %1691 = vmatpush2.msra.mxu0 %v1268_v36  ;;  %v2114_v3 = vadd.f32 %v1185_v17, %v1109_v15  ;;  %v1428_v11 = vld [vmem:[#allocation7 + $0x730] sm:$0xff]  ;;  %v1425_v36 = vld [vmem:[#allocation7 + $0x718] sm:$0xff] }
 0x25b   :  { %v1187_v22 = vpop.f32.mrf.mxu1  ;;  %1692 = vmatprep.subr.mxu0 %v1265_v14  ;;  %v1424_v12 = vld [vmem:[#allocation7 + $0x710] sm:$0xff]  ;;  %v1421_v14 = vld [vmem:[#allocation7 + $0x6f8] sm:$0xff] }
 0x25c   :  { %v2116_v0 = vadd.f32 %v1187_v22, %v1111_v19  ;;  %1617 = vmatprep.mubr.f32.mxu1 %v1193_v23  ;;  %1693 = vmatpush2.msra.mxu0 %v1264_v18  ;;  %v1196_v29 = vmax.f32 %v2114_v3, 0.0  ;;  %v1420_v15 = vld [vmem:[#allocation7 + $0x6f0] sm:$0xff]  ;;  %v1417_v17 = vld [vmem:[#allocation7 + $0x6d8] sm:$0xff] }
 0x25d   :  { %1618 = vmatmul.mubr.f32.vlgmr.msra.gmra.mxu1 %v1192_v6  ;;  %1695 = vmatmul.mubr.f32.vlgmr.msra.gmra.mxu0 %v1190_v58  ;;  %v1373_v58 = vld [vmem:[#allocation7 + $0x578] sm:$0xff]  ;;  %v1416_v18 = vld [vmem:[#allocation7 + $0x6d0] sm:$0xff] }
 0x25e   :  { %v1197_v16 = vmax.f32 %v2116_v0, 0.0  ;;  %1708 = vmatpush1.msra.mxu1 %v1388_v13  ;;  %1700 = vmatprep.mubr.f32.mxu0 %v1195_v31  ;;  %v1369_v31 = vld [vmem:[#allocation7 + $0x558] sm:$0xff]  ;;  %v1408_v13 = vld [vmem:[#allocation7 + $0x690] sm:$0xff] }
 0x25f   :  { %1709 = vmatprep.subr.mxu1 %v1385_v25  ;;  %v1413_v19 = vld [vmem:[#allocation7 + $0x6b8] sm:$0xff] }
 0x260   :  { %1710 = vmatpush1.msra.mxu1 %v1384_v26  ;;  %1623 = vmatprep.mubr.f32.mxu1 %v1197_v16  ;;  %v1409_v22 = vld [vmem:[#allocation7 + $0x698] sm:$0xff]  ;;  %v1404_v26 = vld [vmem:[#allocation7 + $0x670] sm:$0xff] }
 0x261   :  { %1711 = vmatprep.subr.mxu1 %v1381_v28  ;;  %1624 = vmatmul.mubr.f32.gmra.mxu1 %v1196_v29  ;;  %v1405_v25 = vld [vmem:[#allocation7 + $0x678] sm:$0xff] }
 0x262   :  { %1701 = vmatmul.mubr.f32.gmra.mxu0 %v1194_v39  ;;  %1712 = vmatpush1.msra.mxu1 %v1380_v21  ;;  %v1356_v39 = vld [vmem:[#allocation7 + $0x4f0] sm:$0xff]  ;;  %v1401_v28 = vld [vmem:[#allocation7 + $0x658] sm:$0xff] }
 0x263   :  { %1713 = vmatprep.subr.mxu1 %v1377_v32  ;;  %1771 = vmatprep.mubr.f32.mxu1 %v1193_v23  ;;  %v1412_v23 = vld [vmem:[#allocation7 + $0x6b0] sm:$0xff]  ;;  %v1397_v32 = vld [vmem:[#allocation7 + $0x638] sm:$0xff] }
 0x264   :  { %1714 = vmatpush1.msra.mxu1 %v1376_v51  ;;  %v1400_v21 = vld [vmem:[#allocation7 + $0x650] sm:$0xff] }
 0x265   :  { %1715 = vmatprep.subr.mxu1 %v1373_v58  ;;  %v1396_v51 = vld [vmem:[#allocation7 + $0x630] sm:$0xff]  ;;  %v1393_v58 = vld [vmem:[#allocation7 + $0x618] sm:$0xff] }
 0x266   :  { %1716 = vmatpush1.msra.mxu1 %v1372_v1  ;;  %v1392_v1 = vld [vmem:[#allocation7 + $0x610] sm:$0xff] }
 0x267   :  { %1717 = vmatprep.subr.mxu1 %v1369_v31 }
 0x268   :  { %1718 = vmatpush1.msra.mxu1 %v1368_v33  ;;  %v1454_v33 = vld [vmem:[%s2157_s6] sm:$0xf]  ;;  %s1909_s6 = smov [#allocation8]  }
 0x269   :  { %1719 = vmatprep.subr.mxu1 %v1365_v37  ;;  %s1797_s9 = sshll.u32 %s1909_s6, 4  ;;  %s1798_s9 = int_to_ptr.vmem [resolvable:$true] %s1797_s9 }
 0x26a   :  { %1720 = vmatpush1.msra.mxu1 %v1364_v40  ;;  %v1459_v40 = vrot.slane %v1454_v33, %v2017_v20  ;;  %s1877_s10 = scalar_lea.vmem %s1798_s9, 1024  ;;  %p1882_p2 = scmp.lt.s32.totalorder %s1798_s9, %s1798_s9 }
 0x26b   :  { %1721 = vmatprep.subr.mxu1 %v1361_v42  ;;  %v1463_v42 = vrot.slane %v1454_v33, %v2025_v4  ;;  %p1878_p1 = scmp.ne.s32.totalorder %s1798_s9, %s1877_s10  ;;  %p1883_p3 = scmp.lt.s32.totalorder %s1877_s10, %s1877_s10 }
 0x26c   :  { %1722 = vmatpush1.msra.mxu1 %v1360_v45 }
 0x26d   :  { %1723 = vmatprep.subr.mxu1 %v1357_v59  ;;  %p1884_p4 = por %p1883_p3, %p1882_p2 }
 0x26e   :  { %1724 = vmatpush1.msra.mxu1 %v1356_v39 }
 0x26f   :  { %1725 = vmatprep.subr.mxu1 %v1353_v47  ;;  %p1885_p5 = pnand %p1884_p4, %p1878_p1 }
 0x270   :  { %1726 = vmatpush1.msra.mxu1 %v1352_v48 }
 0x271   :  { %1727 = vmatprep.subr.mxu1 %v1349_v49 }
 0x272   :  { %1728 = vmatpush1.msra.mxu1 %v1348_v50 }
 0x273   :  { %1729 = vmatprep.subr.mxu1 %v1345_v52 }
 0x274   :  { %1730 = vmatpush1.msra.mxu1 %v1344_v53  ;;  %v1467_v53 = vrot.slane %v1454_v33, %v2047_v60 }
 0x275   :  { %1731 = vmatprep.subr.mxu1 %v1341_v54  ;;  %v1471_v54 = vrot.slane %v1454_v33, %v2050_v63 }
 0x276   :  { %1732 = vmatpush1.msra.mxu1 %v1340_v55 }
 0x277   :  { %1733 = vmatprep.subr.mxu1 %v1337_v56 }
 0x278   :  { %1734 = vmatpush1.msra.mxu1 %v1336_v57 }
 0x279   :  { %1735 = vmatprep.subr.mxu1 %v1333_v61 }
 0x27a   :  { %1736 = vmatpush1.msra.mxu1 %v1332_v62 }
 0x27b   :  { %1737 = vmatprep.subr.mxu1 %v1329_v2 }
 0x27c   :  { %1738 = vmatpush1.msra.mxu1 %v1328_v27 }
 0x27d   :  { %1739 = vmatprep.subr.mxu1 %v1453_v5 }
 0x27e   :  { %1740 = vmatpush2.msra.mxu1 %v1452_v43 }
 0x27f   :  { %1741 = vmatprep.subr.mxu1 %v1449_v24 }
 0x280   :  { %1742 = vmatpush2.msra.mxu1 %v1448_v34 }
 0x281   :  { %1743 = vmatprep.subr.mxu1 %v1445_v7 }
 0x282   :  { %1744 = vmatpush2.msra.mxu1 %v1444_v38 }
 0x283   :  { %1745 = vmatprep.subr.mxu1 %v1441_v46 }
 0x284   :  { %1746 = vmatpush2.msra.mxu1 %v1440_v8 }
 0x285   :  { %1747 = vmatprep.subr.mxu1 %v1437_v9 }
 0x286   :  { %1748 = vmatpush2.msra.mxu1 %v1436_v30 }
 0x287   :  { %1749 = vmatprep.subr.mxu1 %v1433_v44 }
 0x288   :  { %1750 = vmatpush2.msra.mxu1 %v1432_v10 }
 0x289   :  { %1751 = vmatprep.subr.mxu1 %v1429_v35 }
 0x28a   :  { %1752 = vmatpush2.msra.mxu1 %v1428_v11 }
 0x28b   :  { %1753 = vmatprep.subr.mxu1 %v1425_v36 }
 0x28c   :  { %1754 = vmatpush2.msra.mxu1 %v1424_v12 }
 0x28d   :  { %1755 = vmatprep.subr.mxu1 %v1421_v14 }
 0x28e   :  { %1756 = vmatpush2.msra.mxu1 %v1420_v15 }
 0x28f   :  { %1757 = vmatprep.subr.mxu1 %v1417_v17 }
 0x290   :  { %1758 = vmatpush2.msra.mxu1 %v1416_v18 }
 0x291   :  { %1759 = vmatprep.subr.mxu1 %v1413_v19 }
 0x292   :  { %1760 = vmatpush2.msra.mxu1 %v1412_v23 }
 0x293   :  { %1761 = vmatprep.subr.mxu1 %v1409_v22 }
 0x294   :  { %1762 = vmatpush2.msra.mxu1 %v1408_v13 }
 0x295   :  { %1763 = vmatprep.subr.mxu1 %v1405_v25 }
 0x296   :  { %1764 = vmatpush2.msra.mxu1 %v1404_v26 }
 0x297   :  { %1765 = vmatprep.subr.mxu1 %v1401_v28 }
 0x298   :  { %1766 = vmatpush2.msra.mxu1 %v1400_v21 }
 0x299   :  { %1767 = vmatprep.subr.mxu1 %v1397_v32 }
 0x29a   :  { %1768 = vmatpush2.msra.mxu1 %v1396_v51 }
 0x29b   :  { %1769 = vmatprep.subr.mxu1 %v1393_v58 }
 0x29c   :  { %1770 = vmatpush2.msra.mxu1 %v1392_v1 }
 0x29d   :  { %1772 = vmatmul.mubr.f32.vlgmr.msra.gmra.mxu1 %v1192_v6 }
 0x29e   :  { %1777 = vmatprep.mubr.f32.mxu1 %v1197_v16 }
 0x2a1   :  { %1778 = vmatmul.mubr.f32.gmra.mxu1 %v1196_v29 }
 0x2dd   :  { %v1542_v31 = vpop.f32.mrf.mxu0 }
 0x2de   :  { %v1543_v59 = vadd.f32 %v1542_v31, %v1459_v40 }
 0x2df   :  { %v1544_v37 = vpop.f32.mrf.mxu0 }
 0x2e0   :  { %v1545_v6 = vadd.f32 %v1544_v37, %v1463_v42 }
 0x2e1   :  { %v1548_v45 = vpop.f32.mrf.mxu0 }
 0x2e2   :  { %v1549_v47 = vadd.f32 %v1548_v45, %v1459_v40 }
 0x2e3   :  { %v1550_v0 = vpop.f32.mrf.mxu0 }
 0x2e4   :  { %v1551_v48 = vadd.f32 %v1550_v0, %v1463_v42 }
 0x31d   :  { %v1619_v41 = vpop.f32.mrf.mxu1  ;;  %v1696_v20 = vpop.f32.mrf.mxu0 }
 0x31e   :  { %v1620_v39 = vadd.f32 %v1619_v41, %v1543_v59  ;;  %v1697_v56 = vadd.f32 %v1696_v20, %v1467_v53 }
 0x31f   :  { %v1621_v16 = vpop.f32.mrf.mxu1  ;;  %v1698_v4 = vpop.f32.mrf.mxu0 }
 0x320   :  { %1784 = vst [vmem:[#allocation8] sm:$0xff] %v1620_v39  ;;  %v1622_v3 = vadd.f32 %v1621_v16, %v1545_v6  ;;  %v1699_v61 = vadd.f32 %v1698_v4, %v1471_v54 }
 0x321   :  { %v1625_v29 = vpop.f32.mrf.mxu1 }
 0x322   :  { %1785 = vst [vmem:[#allocation8 + $0x8] sm:$0xff] %v1622_v3  ;;  %v1626_v49 = vadd.f32 %v1625_v29, %v1549_v47  ;;  %v1702_v55 = vpop.f32.mrf.mxu0 }
 0x323   :  { %v1627_v50 = vpop.f32.mrf.mxu1  ;;  %v1703_v5 = vadd.f32 %v1702_v55, %v1467_v53 }
 0x324   :  { %1788 = vst [vmem:[#allocation8 + $0x20] sm:$0xff] %v1626_v49  ;;  %v1628_v52 = vadd.f32 %v1627_v50, %v1551_v48  ;;  %v1704_v2 = vpop.f32.mrf.mxu0 }
 0x325   :  { %v1705_v34 = vadd.f32 %v1704_v2, %v1471_v54 }
 0x326   :  { %1789 = vst [vmem:[#allocation8 + $0x28] sm:$0xff] %v1628_v52 }
 0x35d   :  { %v1773_v57 = vpop.f32.mrf.mxu1 }
 0x35e   :  { %v1774_v62 = vadd.f32 %v1773_v57, %v1697_v56 }
 0x35f   :  { %v1775_v27 = vpop.f32.mrf.mxu1 }
 0x360   :  { %1786 = vst [vmem:[#allocation8 + $0x10] sm:$0xff] %v1774_v62  ;;  %v1776_v43 = vadd.f32 %v1775_v27, %v1699_v61 }
 0x361   :  { %v1779_v24 = vpop.f32.mrf.mxu1 }
 0x362   :  { %1787 = vst [vmem:[#allocation8 + $0x18] sm:$0xff] %v1776_v43  ;;  %v1780_v7 = vadd.f32 %v1779_v24, %v1703_v5 }
 0x363   :  { %v1781_v38 = vpop.f32.mrf.mxu1 }
 0x364   :  { %1790 = vst [vmem:[#allocation8 + $0x30] sm:$0xff] %v1780_v7  ;;  %v1782_v60 = vadd.f32 %v1781_v38, %v1705_v34 }
 0x366   :  { %1791 = vst [vmem:[#allocation8 + $0x38] sm:$0xff] %v1782_v60 }
 0x367   :  { %1888 = shalt.err (!%p1885_p5)
}
 0x368   :  { %1803 = dma.vmem_to_hbm [thread:$0]  %s1798_s9, 1024, %s2158_s7, [#allocation4], %s1905_s29, %s1905_s29, %s1906_s30  }
 0x369   :  { %1901 = dma.done.wait [#allocation4], 1024  }
 0x36a   :  { %1902 = vsyncadd [#allocation4], 4294966272 }
 0x36b   :  { %1807 = vsyncpa [#allocation3], 1 }
 0x36c   :  { %1808 = vsyncpa [#allocation6], 1 }
 0x36d   :  { %1809 = vsyncpa [#allocation4], 1 }

</bundles_post_ra>
